<compile_context>
chip_gen: v6e
topology: v6e:2x2x1
jax: 0.10.0
libtpu: 0.0.40
codegen_flags: <defaults>
</compile_context>

<pallas_src>
import functools
from math import sqrt

import jax
import jax.numpy as jnp
from jax.experimental import pallas as pl
from jax.experimental.pallas import tpu as pltpu


# ----------------------------- Fused AttentionLayer kernel -------------------

def _attention_layer_kernel(q_in_ref, k_in_ref, v_in_ref,
                            wq_ref, bq_ref, wk_ref, bk_ref,
                            wv_ref, bv_ref, wo_ref, bo_ref,
                            o_ref,
                            q_scr, k_scr, v_scr, m_scr, l_scr, acc_scr,
                            *, n_heads, d_keys, d_values, scale, compute_dtype):
    """One (batch, q-tile, kv-tile) grid step of the fused AttentionLayer.

    q_in: (1, tq, d_model)   k_in / v_in: (1, tk, d_model)
    o:    (1, tq, d_model)   written only on the last KV step.
    Scratch (persists across the innermost 'arbitrary' KV axis):
      q_scr   (tq, H*dk)   projected + scaled Q tile (compute_dtype)
      k_scr   (tk, H*dk)   projected K tile          (compute_dtype)
      v_scr   (tk, H*dv)   projected V tile          (compute_dtype)
      m_scr   (tq, H)      per-head running max              (f32)
      l_scr   (tq, H)      per-head running softmax denom    (f32)
      acc_scr (tq, H*dv)   per-head un-normalized context, concatenated (f32)
    """
    f32 = jnp.float32
    ki = pl.program_id(2)
    nk = pl.num_programs(2)

    # ---- first KV step: project this Q tile once, reset online-softmax state.
    @pl.when(ki == 0)
    def _init():
        x_q = q_in_ref[0].astype(compute_dtype)                       # (tq, dm)
        q = jnp.dot(x_q, wq_ref[...].astype(compute_dtype),
                    preferred_element_type=f32) + bq_ref[...]
        q_scr[...] = (q * scale).astype(compute_dtype)                # fold 1/sqrt(dk)
        m_scr[...] = jnp.full(m_scr.shape, -jnp.inf, dtype=m_scr.dtype)
        l_scr[...] = jnp.zeros(l_scr.shape, dtype=l_scr.dtype)
        acc_scr[...] = jnp.zeros(acc_scr.shape, dtype=acc_scr.dtype)

    # ---- every KV step: project this K/V tile into VMEM scratch so heads are
    #      addressed as static column slices of refs (not of live values).
    x_k = k_in_ref[0].astype(compute_dtype)                           # (tk, dm)
    x_v = v_in_ref[0].astype(compute_dtype)
    k_scr[...] = (jnp.dot(x_k, wk_ref[...].astype(compute_dtype),
                          preferred_element_type=f32)
                  + bk_ref[...]).astype(compute_dtype)
    v_scr[...] = (jnp.dot(x_v, wv_ref[...].astype(compute_dtype),
                          preferred_element_type=f32)
                  + bv_ref[...]).astype(compute_dtype)

    # ---- per-head online-softmax update.  All per-head state lives in scratch
    #      refs, so the live working set stays one head wide (no cross-head
    #      vreg spill pressure even at production tile sizes).
    for h in range(n_heads):
        qh = q_scr[:, h * d_keys:(h + 1) * d_keys]                    # (tq, dk)
        kh = k_scr[:, h * d_keys:(h + 1) * d_keys]                    # (tk, dk)
        vh = v_scr[:, h * d_values:(h + 1) * d_values]                # (tk, dv)

        # trans-B matmul: contract the last dims, no explicit transpose (no XLU).
        s = jax.lax.dot_general(qh, kh, (((1,), (1,)), ((), ())),
                                preferred_element_type=f32)           # (tq, tk)

        m_prev = m_scr[:, h:h + 1]                                    # (tq, 1)
        l_prev = l_scr[:, h:h + 1]
        m_new = jnp.maximum(m_prev, jnp.max(s, axis=-1, keepdims=True))
        alpha = jnp.exp(m_prev - m_new)
        p = jnp.exp(s - m_new)                                        # (tq, tk)
        l_scr[:, h:h + 1] = alpha * l_prev + jnp.sum(p, axis=-1, keepdims=True)
        m_scr[:, h:h + 1] = m_new

        cols = slice(h * d_values, (h + 1) * d_values)
        acc_scr[:, cols] = (alpha * acc_scr[:, cols]
                            + jnp.dot(p.astype(compute_dtype), vh,
                                      preferred_element_type=f32))    # (tq, dv)

    # ---- last KV step: normalize and fold ALL heads into ONE full-depth
    #      output-projection matmul (contraction = H*dv rather than dv).
    @pl.when(ki == nk - 1)
    def _finalize():
        l = l_scr[...]                                                # (tq, H)
        r = pl.reciprocal(l, approx=True)                             # EUP slot
        r = r * (2.0 - l * r)                                         # Newton step -> f32 accuracy
        for h in range(n_heads):
            cols = slice(h * d_values, (h + 1) * d_values)
            acc_scr[:, cols] = acc_scr[:, cols] * r[:, h:h + 1]
        out = jnp.dot(acc_scr[...].astype(compute_dtype),
                      wo_ref[...].astype(compute_dtype),
                      preferred_element_type=f32) + bo_ref[...]       # (tq, dm)
        o_ref[0] = out.astype(o_ref.dtype)


# ----------------------------- Wrapper ---------------------------------------

def _pick_tile(n, target):
    """Largest divisor of n that is <= target and a multiple of 8 (Pallas block
    constraint); falls back to the full extent."""
    if n <= target:
        return n
    for t in range(target, 7, -1):
        if n % t == 0 and t % 8 == 0:
            return t
    return n


def attention_layer_forward(params, queries, keys, values, attn_mask=None, *,
                            n_heads, compute_dtype=jnp.bfloat16,
                            q_tile=None, kv_tile=None):
    """queries: (B, L, d_model), keys/values: (B, S, d_model) -> (B, L, d_model)."""
    if attn_mask is not None:
        raise NotImplementedError(
            "attn_mask is not supported: iTransformer uses FullAttention(mask_flag=False)")
    B, L, d_model = queries.shape
    _, S, _ = keys.shape
    H = n_heads
    d_keys = params["wq"].shape[1] // H
    d_values = params["wv"].shape[1] // H
    scale = 1.0 / sqrt(d_keys)

    # Flash-style tiles: full extent at small sizes, otherwise multiple-of-8
    # divisors sized so the (tq, tk) score tile + projected K/V tiles fit the
    # 32 MiB default scoped VMEM (and v7x's 64 MiB physical) with headroom.
    tq = q_tile or _pick_tile(L, 256)
    tk = kv_tile or _pick_tile(S, 512)
    assert L % tq == 0 and S % tk == 0
    nq, nk = L // tq, S // tk

    bq = params["bq"].reshape(1, -1)
    bk = params["bk"].reshape(1, -1)
    bv = params["bv"].reshape(1, -1)
    bo = params["bo"].reshape(1, -1)

    kern = functools.partial(_attention_layer_kernel, n_heads=H, d_keys=d_keys,
                             d_values=d_values, scale=scale,
                             compute_dtype=compute_dtype)

    # Grid-invariant blocks (index_map -> origin): DMA'd once, resident in VMEM.
    # TODO(synk): single-buffer these (pipeline_mode=pl.Buffered(1)) on v7x.
    w_map = lambda b, qi, ki: (0, 0)
    w_spec = lambda arr: pl.BlockSpec(arr.shape, w_map)

    # Explicit VMEM budget (review: size for v7x's 64 MiB / 32 MiB scoped).
    cdb = jnp.dtype(compute_dtype).itemsize
    weight_bytes = 4 * int(params["wq"].size + params["wk"].size
                           + params["wv"].size + params["wo"].size
                           + bq.size + bk.size + bv.size + bo.size)
    act_block_bytes = 4 * (2 * tq * d_model + 2 * tk * d_model)
    scratch_bytes = (cdb * (tq * H * d_keys + tk * (H * d_keys + H * d_values))
                     + 4 * (2 * tq * H + tq * H * d_values))
    vmem_limit = int(min(max(4 * (weight_bytes + act_block_bytes + scratch_bytes),
                             32 * 1024 * 1024), 48 * 1024 * 1024))

    flops = int(2 * B * (L * d_model * H * d_keys                      # Q proj
                         + nq * S * d_model * H * (d_keys + d_values)  # K/V proj (per q-tile)
                         + H * L * S * (d_keys + d_values)             # QK^T + PV
                         + L * H * d_values * d_model))                # out proj
    cost = pl.CostEstimate(
        flops=flops,
        transcendentals=int(B * H * L * S),
        bytes_accessed=int(4 * B * (2 * L + 2 * S) * d_model + weight_bytes))

    return pl.pallas_call(
        kern,
        out_shape=jax.ShapeDtypeStruct((B, L, d_model), queries.dtype),
        grid=(B, nq, nk),
        in_specs=[
            pl.BlockSpec((1, tq, d_model), lambda b, qi, ki: (b, qi, 0)),
            pl.BlockSpec((1, tk, d_model), lambda b, qi, ki: (b, ki, 0)),
            pl.BlockSpec((1, tk, d_model), lambda b, qi, ki: (b, ki, 0)),
            w_spec(params["wq"]), w_spec(bq),
            w_spec(params["wk"]), w_spec(bk),
            w_spec(params["wv"]), w_spec(bv),
            w_spec(params["wo"]), w_spec(bo),
        ],
        out_specs=pl.BlockSpec((1, tq, d_model), lambda b, qi, ki: (b, qi, 0)),
        scratch_shapes=[
            pltpu.VMEM((tq, H * d_keys), compute_dtype),     # q_scr
            pltpu.VMEM((tk, H * d_keys), compute_dtype),     # k_scr
            pltpu.VMEM((tk, H * d_values), compute_dtype),   # v_scr
            pltpu.VMEM((tq, H), jnp.float32),                # m_scr (running max)
            pltpu.VMEM((tq, H), jnp.float32),                # l_scr (running denom)
            pltpu.VMEM((tq, H * d_values), jnp.float32),     # acc_scr (context)
        ],
        compiler_params=pltpu.CompilerParams(
            dimension_semantics=("parallel", "parallel", "arbitrary"),
            vmem_limit_bytes=vmem_limit),
        cost_estimate=cost,
    )(queries, keys, values,
      params["wq"], bq, params["wk"], bk, params["wv"], bv,
      params["wo"], bo)


# ----------------------------- Pure-JAX reference ----------------------------

def reference_forward(params, queries, keys, values, *, n_heads):
    B, L, d_model = queries.shape
    _, S, _ = keys.shape
    H = n_heads
    q = queries @ params["wq"] + params["bq"]
    k = keys @ params["wk"] + params["bk"]
    v = values @ params["wv"] + params["bv"]
    dk = q.shape[-1] // H
    dv = v.shape[-1] // H
    q = q.reshape(B, L, H, dk)
    k = k.reshape(B, S, H, dk)
    v = v.reshape(B, S, H, dv)
    scores = jnp.einsum("blhe,bshe->bhls", q, k) / sqrt(dk)
    a = jax.nn.softmax(scores, axis=-1)
    out = jnp.einsum("bhls,bshd->blhd", a, v).reshape(B, L, H * dv)
    return out @ params["wo"] + params["bo"]


# ----------------------------- Main -------------------------------------------

if __name__ == "__main__":
    # Small, deterministic shapes.  S > kv_tile below so the flash-style
    # streaming / online-softmax accumulate path is actually exercised.
    B, L, S = 2, 8, 16
    d_model, n_heads = 32, 4
    d_keys = d_model // n_heads      # 8
    d_values = d_model // n_heads    # 8

    key = jax.random.PRNGKey(0)
    ks = jax.random.split(key, 11)

    def init(k, shape, scale=0.1):
        return (scale * jax.random.normal(k, shape)).astype(jnp.float32)

    params = {
        "wq": init(ks[0], (d_model, d_keys * n_heads)),
        "bq": init(ks[1], (d_keys * n_heads,)),
        "wk": init(ks[2], (d_model, d_keys * n_heads)),
        "bk": init(ks[3], (d_keys * n_heads,)),
        "wv": init(ks[4], (d_model, d_values * n_heads)),
        "bv": init(ks[5], (d_values * n_heads,)),
        "wo": init(ks[6], (d_values * n_heads, d_model)),
        "bo": init(ks[7], (d_model,)),
    }

    queries = jax.random.normal(ks[8], (B, L, d_model), dtype=jnp.float32)
    keys_in = jax.random.normal(ks[9], (B, S, d_model), dtype=jnp.float32)
    values_in = jax.random.normal(ks[10], (B, S, d_model), dtype=jnp.float32)

    ref = reference_forward(params, queries, keys_in, values_in, n_heads=n_heads)

    # Structural check: f32 MXU operands, KV streamed as two tiles (exercises
    # the pl.when init / online-softmax accumulate / finalize path).  The
    # reciprocal is Newton-refined, so the tolerance is bounded only by the
    # default-precision matmuls in the pure-JAX reference, not by the kernel.
    out_f32 = attention_layer_forward(params, queries, keys_in, values_in, None,
                                      n_heads=n_heads,
                                      compute_dtype=jnp.float32, kv_tile=8)
    out_f32 = jax.block_until_ready(out_f32)
    assert out_f32.shape == (B, L, d_model)
    assert jnp.allclose(out_f32, ref, atol=5e-3, rtol=5e-3), "f32 path mismatch"

    # Production config: bf16 MXU operands (f32 stats/accumulation), default
    # tiling.  Tolerance is the bf16 input-rounding floor.
    out_bf16 = attention_layer_forward(params, queries, keys_in, values_in, None,
                                       n_heads=n_heads,
                                       compute_dtype=jnp.bfloat16)
    out_bf16 = jax.block_until_ready(out_bf16)
    assert out_bf16.shape == (B, L, d_model)
    assert jnp.allclose(out_bf16, ref, atol=3e-2, rtol=3e-2), "bf16 path mismatch"

    print("KERNEL_OK")
</pallas_src>

<mosaic_0001>
module attributes {stable_mosaic.version = 11 : i64} {
  func.func @_attention_layer_kernel(%arg0: i32, %arg1: i32, %arg2: i32, %arg3: memref<1x8x32xf32, #tpu.memory_space<vmem>>, %arg4: memref<1x8x32xf32, #tpu.memory_space<vmem>>, %arg5: memref<1x8x32xf32, #tpu.memory_space<vmem>>, %arg6: memref<32x32xf32, #tpu.memory_space<vmem>>, %arg7: memref<1x32xf32, #tpu.memory_space<vmem>>, %arg8: memref<32x32xf32, #tpu.memory_space<vmem>>, %arg9: memref<1x32xf32, #tpu.memory_space<vmem>>, %arg10: memref<32x32xf32, #tpu.memory_space<vmem>>, %arg11: memref<1x32xf32, #tpu.memory_space<vmem>>, %arg12: memref<32x32xf32, #tpu.memory_space<vmem>>, %arg13: memref<1x32xf32, #tpu.memory_space<vmem>>, %arg14: memref<1x8x32xf32, #tpu.memory_space<vmem>>, %arg15: memref<8x32xf32, #tpu.memory_space<vmem>>, %arg16: memref<8x32xf32, #tpu.memory_space<vmem>>, %arg17: memref<8x32xf32, #tpu.memory_space<vmem>>, %arg18: memref<8x4xf32, #tpu.memory_space<vmem>>, %arg19: memref<8x4xf32, #tpu.memory_space<vmem>>, %arg20: memref<8x32xf32, #tpu.memory_space<vmem>>) attributes {dimension_semantics = [#tpu.dimension_semantics<parallel>, #tpu.dimension_semantics<parallel>, #tpu.dimension_semantics<arbitrary>], iteration_bounds = array<i64: 2, 1, 2>, scalar_prefetch = 0 : i64, scratch_operands = 6 : i64, tpu.core_type = #tpu.core_type<tc>, window_params = [{transform_indices = @transform_0, window_bounds = array<i64: 1, 8, 32>}, {transform_indices = @transform_1, window_bounds = array<i64: 1, 8, 32>}, {transform_indices = @transform_2, window_bounds = array<i64: 1, 8, 32>}, {pipeline_mode = #tpu.pipeline_mode<synchronous>, transform_indices = @transform_3, window_bounds = array<i64: 32, 32>}, {pipeline_mode = #tpu.pipeline_mode<synchronous>, transform_indices = @transform_4, window_bounds = array<i64: 1, 32>}, {pipeline_mode = #tpu.pipeline_mode<synchronous>, transform_indices = @transform_5, window_bounds = array<i64: 32, 32>}, {pipeline_mode = #tpu.pipeline_mode<synchronous>, transform_indices = @transform_6, window_bounds = array<i64: 1, 32>}, {pipeline_mode = #tpu.pipeline_mode<synchronous>, transform_indices = @transform_7, window_bounds = array<i64: 32, 32>}, {pipeline_mode = #tpu.pipeline_mode<synchronous>, transform_indices = @transform_8, window_bounds = array<i64: 1, 32>}, {pipeline_mode = #tpu.pipeline_mode<synchronous>, transform_indices = @transform_9, window_bounds = array<i64: 32, 32>}, {pipeline_mode = #tpu.pipeline_mode<synchronous>, transform_indices = @transform_10, window_bounds = array<i64: 1, 32>}, {transform_indices = @transform_11, window_bounds = array<i64: 1, 8, 32>}]} {
    %c0_i32 = arith.constant 0 : i32
    %0 = arith.cmpi eq, %arg2, %c0_i32 : i32
    %1 = arith.extui %0 : i1 to i32
    %c0_i32_0 = arith.constant 0 : i32
    %2 = arith.cmpi ne, %1, %c0_i32_0 : i32
    scf.if %2 {
      %c0_102 = arith.constant 0 : index
      %c0_103 = arith.constant 0 : index
      %c0_104 = arith.constant 0 : index
      %126 = vector.load %arg3[%c0_102, %c0_103, %c0_104] : memref<1x8x32xf32, #tpu.memory_space<vmem>>, vector<1x8x32xf32>
      %127 = vector.shape_cast %126 : vector<1x8x32xf32> to vector<8x32xf32>
      %c0_105 = arith.constant 0 : index
      %c0_106 = arith.constant 0 : index
      %128 = vector.load %arg6[%c0_105, %c0_106] : memref<32x32xf32, #tpu.memory_space<vmem>>, vector<32x32xf32>
      %cst_107 = arith.constant dense<0.000000e+00> : vector<8x32xf32>
      %129 = tpu.matmul %127, %128, %cst_107 {dimension_numbers = #tpu.dot_dimension_numbers<[1], [0], [0], [1], [0, 0, 1, 1], [], []>} : vector<8x32xf32>, vector<32x32xf32>, vector<8x32xf32> -> vector<8x32xf32>
      %c0_108 = arith.constant 0 : index
      %c0_109 = arith.constant 0 : index
      %130 = vector.load %arg7[%c0_108, %c0_109] : memref<1x32xf32, #tpu.memory_space<vmem>>, vector<1x32xf32>
      %131 = vector.broadcast %130 : vector<1x32xf32> to vector<8x32xf32>
      %132 = arith.addf %129, %131 : vector<8x32xf32>
      %cst_110 = arith.constant 0.353553385 : f32
      %133 = vector.broadcast %cst_110 : f32 to vector<8x32xf32>
      %134 = arith.mulf %132, %133 : vector<8x32xf32>
      %c0_111 = arith.constant 0 : index
      %c0_112 = arith.constant 0 : index
      %135 = vector.load %arg15[%c0_111, %c0_112] : memref<8x32xf32, #tpu.memory_space<vmem>>, vector<8x32xf32>
      tpu.vector_store %arg15[%c0_111, %c0_112], %134 {strides = array<i32>} : memref<8x32xf32, #tpu.memory_space<vmem>>, vector<8x32xf32>,
      %cst_113 = arith.constant 0xFF800000 : f32
      %136 = vector.broadcast %cst_113 : f32 to vector<8x4xf32>
      %c0_114 = arith.constant 0 : index
      %c0_115 = arith.constant 0 : index
      %137 = vector.load %arg18[%c0_114, %c0_115] : memref<8x4xf32, #tpu.memory_space<vmem>>, vector<8x4xf32>
      tpu.vector_store %arg18[%c0_114, %c0_115], %136 {strides = array<i32>} : memref<8x4xf32, #tpu.memory_space<vmem>>, vector<8x4xf32>,
      %cst_116 = arith.constant 0.000000e+00 : f32
      %138 = vector.broadcast %cst_116 : f32 to vector<8x4xf32>
      %c0_117 = arith.constant 0 : index
      %c0_118 = arith.constant 0 : index
      %139 = vector.load %arg19[%c0_117, %c0_118] : memref<8x4xf32, #tpu.memory_space<vmem>>, vector<8x4xf32>
      tpu.vector_store %arg19[%c0_117, %c0_118], %138 {strides = array<i32>} : memref<8x4xf32, #tpu.memory_space<vmem>>, vector<8x4xf32>,
      %cst_119 = arith.constant 0.000000e+00 : f32
      %140 = vector.broadcast %cst_119 : f32 to vector<8x32xf32>
      %c0_120 = arith.constant 0 : index
      %c0_121 = arith.constant 0 : index
      %141 = vector.load %arg20[%c0_120, %c0_121] : memref<8x32xf32, #tpu.memory_space<vmem>>, vector<8x32xf32>
      tpu.vector_store %arg20[%c0_120, %c0_121], %140 {strides = array<i32>} : memref<8x32xf32, #tpu.memory_space<vmem>>, vector<8x32xf32>,
    } else {
    }
    %c0 = arith.constant 0 : index
    %c0_1 = arith.constant 0 : index
    %c0_2 = arith.constant 0 : index
    %3 = vector.load %arg4[%c0, %c0_1, %c0_2] : memref<1x8x32xf32, #tpu.memory_space<vmem>>, vector<1x8x32xf32>
    %4 = vector.shape_cast %3 : vector<1x8x32xf32> to vector<8x32xf32>
    %c0_3 = arith.constant 0 : index
    %c0_4 = arith.constant 0 : index
    %c0_5 = arith.constant 0 : index
    %5 = vector.load %arg5[%c0_3, %c0_4, %c0_5] : memref<1x8x32xf32, #tpu.memory_space<vmem>>, vector<1x8x32xf32>
    %6 = vector.shape_cast %5 : vector<1x8x32xf32> to vector<8x32xf32>
    %c0_6 = arith.constant 0 : index
    %c0_7 = arith.constant 0 : index
    %7 = vector.load %arg8[%c0_6, %c0_7] : memref<32x32xf32, #tpu.memory_space<vmem>>, vector<32x32xf32>
    %cst = arith.constant dense<0.000000e+00> : vector<8x32xf32>
    %8 = tpu.matmul %4, %7, %cst {dimension_numbers = #tpu.dot_dimension_numbers<[1], [0], [0], [1], [0, 0, 1, 1], [], []>} : vector<8x32xf32>, vector<32x32xf32>, vector<8x32xf32> -> vector<8x32xf32>
    %c0_8 = arith.constant 0 : index
    %c0_9 = arith.constant 0 : index
    %9 = vector.load %arg9[%c0_8, %c0_9] : memref<1x32xf32, #tpu.memory_space<vmem>>, vector<1x32xf32>
    %10 = vector.broadcast %9 : vector<1x32xf32> to vector<8x32xf32>
    %11 = arith.addf %8, %10 : vector<8x32xf32>
    %c0_10 = arith.constant 0 : index
    %c0_11 = arith.constant 0 : index
    %12 = vector.load %arg16[%c0_10, %c0_11] : memref<8x32xf32, #tpu.memory_space<vmem>>, vector<8x32xf32>
    tpu.vector_store %arg16[%c0_10, %c0_11], %11 {strides = array<i32>} : memref<8x32xf32, #tpu.memory_space<vmem>>, vector<8x32xf32>,
    %c0_12 = arith.constant 0 : index
    %c0_13 = arith.constant 0 : index
    %13 = vector.load %arg10[%c0_12, %c0_13] : memref<32x32xf32, #tpu.memory_space<vmem>>, vector<32x32xf32>
    %cst_14 = arith.constant dense<0.000000e+00> : vector<8x32xf32>
    %14 = tpu.matmul %6, %13, %cst_14 {dimension_numbers = #tpu.dot_dimension_numbers<[1], [0], [0], [1], [0, 0, 1, 1], [], []>} : vector<8x32xf32>, vector<32x32xf32>, vector<8x32xf32> -> vector<8x32xf32>
    %c0_15 = arith.constant 0 : index
    %c0_16 = arith.constant 0 : index
    %15 = vector.load %arg11[%c0_15, %c0_16] : memref<1x32xf32, #tpu.memory_space<vmem>>, vector<1x32xf32>
    %16 = vector.broadcast %15 : vector<1x32xf32> to vector<8x32xf32>
    %17 = arith.addf %14, %16 : vector<8x32xf32>
    %c0_17 = arith.constant 0 : index
    %c0_18 = arith.constant 0 : index
    %18 = vector.load %arg17[%c0_17, %c0_18] : memref<8x32xf32, #tpu.memory_space<vmem>>, vector<8x32xf32>
    tpu.vector_store %arg17[%c0_17, %c0_18], %17 {strides = array<i32>} : memref<8x32xf32, #tpu.memory_space<vmem>>, vector<8x32xf32>,
    %c0_19 = arith.constant 0 : index
    %c0_20 = arith.constant 0 : index
    %19 = vector.load %arg15[%c0_19, %c0_20] : memref<8x32xf32, #tpu.memory_space<vmem>>, vector<8x8xf32>
    %c0_21 = arith.constant 0 : index
    %c0_22 = arith.constant 0 : index
    %20 = vector.load %arg16[%c0_21, %c0_22] : memref<8x32xf32, #tpu.memory_space<vmem>>, vector<8x8xf32>
    %c0_23 = arith.constant 0 : index
    %c0_24 = arith.constant 0 : index
    %21 = vector.load %arg17[%c0_23, %c0_24] : memref<8x32xf32, #tpu.memory_space<vmem>>, vector<8x8xf32>
    %cst_25 = arith.constant dense<0.000000e+00> : vector<8x8xf32>
    %22 = tpu.matmul %19, %20, %cst_25 {dimension_numbers = #tpu.dot_dimension_numbers<[1], [1], [0], [0], [0, 0, 1, 0], [], []>} : vector<8x8xf32>, vector<8x8xf32>, vector<8x8xf32> -> vector<8x8xf32>
    %c0_26 = arith.constant 0 : index
    %c0_27 = arith.constant 0 : index
    %23 = vector.load %arg18[%c0_26, %c0_27] : memref<8x4xf32, #tpu.memory_space<vmem>>, vector<8x1xf32>
    %c0_28 = arith.constant 0 : index
    %c0_29 = arith.constant 0 : index
    %24 = vector.load %arg19[%c0_28, %c0_29] : memref<8x4xf32, #tpu.memory_space<vmem>>, vector<8x1xf32>
    %cst_30 = arith.constant dense<0xFF800000> : vector<8xf32>
    %25 = vector.multi_reduction <maximumf>, %22, %cst_30 [1] : vector<8x8xf32> to vector<8xf32>
    %26 = vector.shape_cast %25 : vector<8xf32> to vector<8x1xf32>
    %27 = arith.maximumf %23, %26 : vector<8x1xf32>
    %28 = arith.subf %23, %27 : vector<8x1xf32>
    %29 = math.exp %28 : vector<8x1xf32>
    %30 = vector.broadcast %27 : vector<8x1xf32> to vector<8x8xf32>
    %31 = arith.subf %22, %30 : vector<8x8xf32>
    %32 = math.exp %31 : vector<8x8xf32>
    %33 = arith.mulf %29, %24 : vector<8x1xf32>
    %cst_31 = arith.constant dense<0.000000e+00> : vector<8xf32>
    %34 = vector.multi_reduction <add>, %32, %cst_31 [1] : vector<8x8xf32> to vector<8xf32>
    %35 = vector.shape_cast %34 : vector<8xf32> to vector<8x1xf32>
    %36 = arith.addf %33, %35 : vector<8x1xf32>
    %c0_32 = arith.constant 0 : index
    %c0_33 = arith.constant 0 : index
    %37 = vector.load %arg19[%c0_32, %c0_33] : memref<8x4xf32, #tpu.memory_space<vmem>>, vector<8x1xf32>
    tpu.vector_store %arg19[%c0_32, %c0_33], %36 {strides = array<i32>} : memref<8x4xf32, #tpu.memory_space<vmem>>, vector<8x1xf32>,
    %c0_34 = arith.constant 0 : index
    %c0_35 = arith.constant 0 : index
    %38 = vector.load %arg18[%c0_34, %c0_35] : memref<8x4xf32, #tpu.memory_space<vmem>>, vector<8x1xf32>
    tpu.vector_store %arg18[%c0_34, %c0_35], %27 {strides = array<i32>} : memref<8x4xf32, #tpu.memory_space<vmem>>, vector<8x1xf32>,
    %c0_36 = arith.constant 0 : index
    %c0_37 = arith.constant 0 : index
    %39 = vector.load %arg20[%c0_36, %c0_37] : memref<8x32xf32, #tpu.memory_space<vmem>>, vector<8x8xf32>
    %40 = vector.broadcast %29 : vector<8x1xf32> to vector<8x8xf32>
    %41 = arith.mulf %40, %39 : vector<8x8xf32>
    %cst_38 = arith.constant dense<0.000000e+00> : vector<8x8xf32>
    %42 = tpu.matmul %32, %21, %cst_38 {dimension_numbers = #tpu.dot_dimension_numbers<[1], [0], [0], [1], [0, 0, 1, 1], [], []>} : vector<8x8xf32>, vector<8x8xf32>, vector<8x8xf32> -> vector<8x8xf32>
    %43 = arith.addf %41, %42 : vector<8x8xf32>
    %c0_39 = arith.constant 0 : index
    %c0_40 = arith.constant 0 : index
    %44 = vector.load %arg20[%c0_39, %c0_40] : memref<8x32xf32, #tpu.memory_space<vmem>>, vector<8x8xf32>
    tpu.vector_store %arg20[%c0_39, %c0_40], %43 {strides = array<i32>} : memref<8x32xf32, #tpu.memory_space<vmem>>, vector<8x8xf32>,
    %c0_41 = arith.constant 0 : index
    %c8 = arith.constant 8 : index
    %45 = vector.load %arg15[%c0_41, %c8] : memref<8x32xf32, #tpu.memory_space<vmem>>, vector<8x8xf32>
    %c0_42 = arith.constant 0 : index
    %c8_43 = arith.constant 8 : index
    %46 = vector.load %arg16[%c0_42, %c8_43] : memref<8x32xf32, #tpu.memory_space<vmem>>, vector<8x8xf32>
    %c0_44 = arith.constant 0 : index
    %c8_45 = arith.constant 8 : index
    %47 = vector.load %arg17[%c0_44, %c8_45] : memref<8x32xf32, #tpu.memory_space<vmem>>, vector<8x8xf32>
    %cst_46 = arith.constant dense<0.000000e+00> : vector<8x8xf32>
    %48 = tpu.matmul %45, %46, %cst_46 {dimension_numbers = #tpu.dot_dimension_numbers<[1], [1], [0], [0], [0, 0, 1, 0], [], []>} : vector<8x8xf32>, vector<8x8xf32>, vector<8x8xf32> -> vector<8x8xf32>
    %c0_47 = arith.constant 0 : index
    %c1 = arith.constant 1 : index
    %49 = vector.load %arg18[%c0_47, %c1] : memref<8x4xf32, #tpu.memory_space<vmem>>, vector<8x1xf32>
    %c0_48 = arith.constant 0 : index
    %c1_49 = arith.constant 1 : index
    %50 = vector.load %arg19[%c0_48, %c1_49] : memref<8x4xf32, #tpu.memory_space<vmem>>, vector<8x1xf32>
    %cst_50 = arith.constant dense<0xFF800000> : vector<8xf32>
    %51 = vector.multi_reduction <maximumf>, %48, %cst_50 [1] : vector<8x8xf32> to vector<8xf32>
    %52 = vector.shape_cast %51 : vector<8xf32> to vector<8x1xf32>
    %53 = arith.maximumf %49, %52 : vector<8x1xf32>
    %54 = arith.subf %49, %53 : vector<8x1xf32>
    %55 = math.exp %54 : vector<8x1xf32>
    %56 = vector.broadcast %53 : vector<8x1xf32> to vector<8x8xf32>
    %57 = arith.subf %48, %56 : vector<8x8xf32>
    %58 = math.exp %57 : vector<8x8xf32>
    %59 = arith.mulf %55, %50 : vector<8x1xf32>
    %cst_51 = arith.constant dense<0.000000e+00> : vector<8xf32>
    %60 = vector.multi_reduction <add>, %58, %cst_51 [1] : vector<8x8xf32> to vector<8xf32>
    %61 = vector.shape_cast %60 : vector<8xf32> to vector<8x1xf32>
    %62 = arith.addf %59, %61 : vector<8x1xf32>
    %c0_52 = arith.constant 0 : index
    %c1_53 = arith.constant 1 : index
    %63 = vector.load %arg19[%c0_52, %c1_53] : memref<8x4xf32, #tpu.memory_space<vmem>>, vector<8x1xf32>
    tpu.vector_store %arg19[%c0_52, %c1_53], %62 {strides = array<i32>} : memref<8x4xf32, #tpu.memory_space<vmem>>, vector<8x1xf32>,
    %c0_54 = arith.constant 0 : index
    %c1_55 = arith.constant 1 : index
    %64 = vector.load %arg18[%c0_54, %c1_55] : memref<8x4xf32, #tpu.memory_space<vmem>>, vector<8x1xf32>
    tpu.vector_store %arg18[%c0_54, %c1_55], %53 {strides = array<i32>} : memref<8x4xf32, #tpu.memory_space<vmem>>, vector<8x1xf32>,
    %c0_56 = arith.constant 0 : index
    %c8_57 = arith.constant 8 : index
    %65 = vector.load %arg20[%c0_56, %c8_57] : memref<8x32xf32, #tpu.memory_space<vmem>>, vector<8x8xf32>
    %66 = vector.broadcast %55 : vector<8x1xf32> to vector<8x8xf32>
    %67 = arith.mulf %66, %65 : vector<8x8xf32>
    %cst_58 = arith.constant dense<0.000000e+00> : vector<8x8xf32>
    %68 = tpu.matmul %58, %47, %cst_58 {dimension_numbers = #tpu.dot_dimension_numbers<[1], [0], [0], [1], [0, 0, 1, 1], [], []>} : vector<8x8xf32>, vector<8x8xf32>, vector<8x8xf32> -> vector<8x8xf32>
    %69 = arith.addf %67, %68 : vector<8x8xf32>
    %c0_59 = arith.constant 0 : index
    %c8_60 = arith.constant 8 : index
    %70 = vector.load %arg20[%c0_59, %c8_60] : memref<8x32xf32, #tpu.memory_space<vmem>>, vector<8x8xf32>
    tpu.vector_store %arg20[%c0_59, %c8_60], %69 {strides = array<i32>} : memref<8x32xf32, #tpu.memory_space<vmem>>, vector<8x8xf32>,
    %c0_61 = arith.constant 0 : index
    %c16 = arith.constant 16 : index
    %71 = vector.load %arg15[%c0_61, %c16] : memref<8x32xf32, #tpu.memory_space<vmem>>, vector<8x8xf32>
    %c0_62 = arith.constant 0 : index
    %c16_63 = arith.constant 16 : index
    %72 = vector.load %arg16[%c0_62, %c16_63] : memref<8x32xf32, #tpu.memory_space<vmem>>, vector<8x8xf32>
    %c0_64 = arith.constant 0 : index
    %c16_65 = arith.constant 16 : index
    %73 = vector.load %arg17[%c0_64, %c16_65] : memref<8x32xf32, #tpu.memory_space<vmem>>, vector<8x8xf32>
    %cst_66 = arith.constant dense<0.000000e+00> : vector<8x8xf32>
    %74 = tpu.matmul %71, %72, %cst_66 {dimension_numbers = #tpu.dot_dimension_numbers<[1], [1], [0], [0], [0, 0, 1, 0], [], []>} : vector<8x8xf32>, vector<8x8xf32>, vector<8x8xf32> -> vector<8x8xf32>
    %c0_67 = arith.constant 0 : index
    %c2 = arith.constant 2 : index
    %75 = vector.load %arg18[%c0_67, %c2] : memref<8x4xf32, #tpu.memory_space<vmem>>, vector<8x1xf32>
    %c0_68 = arith.constant 0 : index
    %c2_69 = arith.constant 2 : index
    %76 = vector.load %arg19[%c0_68, %c2_69] : memref<8x4xf32, #tpu.memory_space<vmem>>, vector<8x1xf32>
    %cst_70 = arith.constant dense<0xFF800000> : vector<8xf32>
    %77 = vector.multi_reduction <maximumf>, %74, %cst_70 [1] : vector<8x8xf32> to vector<8xf32>
    %78 = vector.shape_cast %77 : vector<8xf32> to vector<8x1xf32>
    %79 = arith.maximumf %75, %78 : vector<8x1xf32>
    %80 = arith.subf %75, %79 : vector<8x1xf32>
    %81 = math.exp %80 : vector<8x1xf32>
    %82 = vector.broadcast %79 : vector<8x1xf32> to vector<8x8xf32>
    %83 = arith.subf %74, %82 : vector<8x8xf32>
    %84 = math.exp %83 : vector<8x8xf32>
    %85 = arith.mulf %81, %76 : vector<8x1xf32>
    %cst_71 = arith.constant dense<0.000000e+00> : vector<8xf32>
    %86 = vector.multi_reduction <add>, %84, %cst_71 [1] : vector<8x8xf32> to vector<8xf32>
    %87 = vector.shape_cast %86 : vector<8xf32> to vector<8x1xf32>
    %88 = arith.addf %85, %87 : vector<8x1xf32>
    %c0_72 = arith.constant 0 : index
    %c2_73 = arith.constant 2 : index
    %89 = vector.load %arg19[%c0_72, %c2_73] : memref<8x4xf32, #tpu.memory_space<vmem>>, vector<8x1xf32>
    tpu.vector_store %arg19[%c0_72, %c2_73], %88 {strides = array<i32>} : memref<8x4xf32, #tpu.memory_space<vmem>>, vector<8x1xf32>,
    %c0_74 = arith.constant 0 : index
    %c2_75 = arith.constant 2 : index
    %90 = vector.load %arg18[%c0_74, %c2_75] : memref<8x4xf32, #tpu.memory_space<vmem>>, vector<8x1xf32>
    tpu.vector_store %arg18[%c0_74, %c2_75], %79 {strides = array<i32>} : memref<8x4xf32, #tpu.memory_space<vmem>>, vector<8x1xf32>,
    %c0_76 = arith.constant 0 : index
    %c16_77 = arith.constant 16 : index
    %91 = vector.load %arg20[%c0_76, %c16_77] : memref<8x32xf32, #tpu.memory_space<vmem>>, vector<8x8xf32>
    %92 = vector.broadcast %81 : vector<8x1xf32> to vector<8x8xf32>
    %93 = arith.mulf %92, %91 : vector<8x8xf32>
    %cst_78 = arith.constant dense<0.000000e+00> : vector<8x8xf32>
    %94 = tpu.matmul %84, %73, %cst_78 {dimension_numbers = #tpu.dot_dimension_numbers<[1], [0], [0], [1], [0, 0, 1, 1], [], []>} : vector<8x8xf32>, vector<8x8xf32>, vector<8x8xf32> -> vector<8x8xf32>
    %95 = arith.addf %93, %94 : vector<8x8xf32>
    %c0_79 = arith.constant 0 : index
    %c16_80 = arith.constant 16 : index
    %96 = vector.load %arg20[%c0_79, %c16_80] : memref<8x32xf32, #tpu.memory_space<vmem>>, vector<8x8xf32>
    tpu.vector_store %arg20[%c0_79, %c16_80], %95 {strides = array<i32>} : memref<8x32xf32, #tpu.memory_space<vmem>>, vector<8x8xf32>,
    %c0_81 = arith.constant 0 : index
    %c24 = arith.constant 24 : index
    %97 = vector.load %arg15[%c0_81, %c24] : memref<8x32xf32, #tpu.memory_space<vmem>>, vector<8x8xf32>
    %c0_82 = arith.constant 0 : index
    %c24_83 = arith.constant 24 : index
    %98 = vector.load %arg16[%c0_82, %c24_83] : memref<8x32xf32, #tpu.memory_space<vmem>>, vector<8x8xf32>
    %c0_84 = arith.constant 0 : index
    %c24_85 = arith.constant 24 : index
    %99 = vector.load %arg17[%c0_84, %c24_85] : memref<8x32xf32, #tpu.memory_space<vmem>>, vector<8x8xf32>
    %cst_86 = arith.constant dense<0.000000e+00> : vector<8x8xf32>
    %100 = tpu.matmul %97, %98, %cst_86 {dimension_numbers = #tpu.dot_dimension_numbers<[1], [1], [0], [0], [0, 0, 1, 0], [], []>} : vector<8x8xf32>, vector<8x8xf32>, vector<8x8xf32> -> vector<8x8xf32>
    %c0_87 = arith.constant 0 : index
    %c3 = arith.constant 3 : index
    %101 = vector.load %arg18[%c0_87, %c3] : memref<8x4xf32, #tpu.memory_space<vmem>>, vector<8x1xf32>
    %c0_88 = arith.constant 0 : index
    %c3_89 = arith.constant 3 : index
    %102 = vector.load %arg19[%c0_88, %c3_89] : memref<8x4xf32, #tpu.memory_space<vmem>>, vector<8x1xf32>
    %cst_90 = arith.constant dense<0xFF800000> : vector<8xf32>
    %103 = vector.multi_reduction <maximumf>, %100, %cst_90 [1] : vector<8x8xf32> to vector<8xf32>
    %104 = vector.shape_cast %103 : vector<8xf32> to vector<8x1xf32>
    %105 = arith.maximumf %101, %104 : vector<8x1xf32>
    %106 = arith.subf %101, %105 : vector<8x1xf32>
    %107 = math.exp %106 : vector<8x1xf32>
    %108 = vector.broadcast %105 : vector<8x1xf32> to vector<8x8xf32>
    %109 = arith.subf %100, %108 : vector<8x8xf32>
    %110 = math.exp %109 : vector<8x8xf32>
    %111 = arith.mulf %107, %102 : vector<8x1xf32>
    %cst_91 = arith.constant dense<0.000000e+00> : vector<8xf32>
    %112 = vector.multi_reduction <add>, %110, %cst_91 [1] : vector<8x8xf32> to vector<8xf32>
    %113 = vector.shape_cast %112 : vector<8xf32> to vector<8x1xf32>
    %114 = arith.addf %111, %113 : vector<8x1xf32>
    %c0_92 = arith.constant 0 : index
    %c3_93 = arith.constant 3 : index
    %115 = vector.load %arg19[%c0_92, %c3_93] : memref<8x4xf32, #tpu.memory_space<vmem>>, vector<8x1xf32>
    tpu.vector_store %arg19[%c0_92, %c3_93], %114 {strides = array<i32>} : memref<8x4xf32, #tpu.memory_space<vmem>>, vector<8x1xf32>,
    %c0_94 = arith.constant 0 : index
    %c3_95 = arith.constant 3 : index
    %116 = vector.load %arg18[%c0_94, %c3_95] : memref<8x4xf32, #tpu.memory_space<vmem>>, vector<8x1xf32>
    tpu.vector_store %arg18[%c0_94, %c3_95], %105 {strides = array<i32>} : memref<8x4xf32, #tpu.memory_space<vmem>>, vector<8x1xf32>,
    %c0_96 = arith.constant 0 : index
    %c24_97 = arith.constant 24 : index
    %117 = vector.load %arg20[%c0_96, %c24_97] : memref<8x32xf32, #tpu.memory_space<vmem>>, vector<8x8xf32>
    %118 = vector.broadcast %107 : vector<8x1xf32> to vector<8x8xf32>
    %119 = arith.mulf %118, %117 : vector<8x8xf32>
    %cst_98 = arith.constant dense<0.000000e+00> : vector<8x8xf32>
    %120 = tpu.matmul %110, %99, %cst_98 {dimension_numbers = #tpu.dot_dimension_numbers<[1], [0], [0], [1], [0, 0, 1, 1], [], []>} : vector<8x8xf32>, vector<8x8xf32>, vector<8x8xf32> -> vector<8x8xf32>
    %121 = arith.addf %119, %120 : vector<8x8xf32>
    %c0_99 = arith.constant 0 : index
    %c24_100 = arith.constant 24 : index
    %122 = vector.load %arg20[%c0_99, %c24_100] : memref<8x32xf32, #tpu.memory_space<vmem>>, vector<8x8xf32>
    tpu.vector_store %arg20[%c0_99, %c24_100], %121 {strides = array<i32>} : memref<8x32xf32, #tpu.memory_space<vmem>>, vector<8x8xf32>,
    %c1_i32 = arith.constant 1 : i32
    %123 = arith.cmpi eq, %arg2, %c1_i32 : i32
    %124 = arith.extui %123 : i1 to i32
    %c0_i32_101 = arith.constant 0 : i32
    %125 = arith.cmpi ne, %124, %c0_i32_101 : i32
    scf.if %125 {
      %c0_102 = arith.constant 0 : index
      %c0_103 = arith.constant 0 : index
      %126 = vector.load %arg19[%c0_102, %c0_103] : memref<8x4xf32, #tpu.memory_space<vmem>>, vector<8x4xf32>
      %127 = tpu.reciprocal %126 {approx = true} : vector<8x4xf32> -> vector<8x4xf32>
      %128 = arith.mulf %126, %127 : vector<8x4xf32>
      %cst_104 = arith.constant 2.000000e+00 : f32
      %129 = vector.broadcast %cst_104 : f32 to vector<8x4xf32>
      %130 = arith.subf %129, %128 : vector<8x4xf32>
      %131 = arith.mulf %127, %130 : vector<8x4xf32>
      %c0_105 = arith.constant 0 : index
      %c0_106 = arith.constant 0 : index
      %132 = vector.load %arg20[%c0_105, %c0_106] : memref<8x32xf32, #tpu.memory_space<vmem>>, vector<8x8xf32>
      %133 = vector.extract_strided_slice %131 {offsets = [0, 0], sizes = [8, 1], strides = [1, 1]} : vector<8x4xf32> to vector<8x1xf32>
      %134 = vector.broadcast %133 : vector<8x1xf32> to vector<8x8xf32>
      %135 = arith.mulf %132, %134 : vector<8x8xf32>
      %c0_107 = arith.constant 0 : index
      %c0_108 = arith.constant 0 : index
      %136 = vector.load %arg20[%c0_107, %c0_108] : memref<8x32xf32, #tpu.memory_space<vmem>>, vector<8x8xf32>
      tpu.vector_store %arg20[%c0_107, %c0_108], %135 {strides = array<i32>} : memref<8x32xf32, #tpu.memory_space<vmem>>, vector<8x8xf32>,
      %c0_109 = arith.constant 0 : index
      %c8_110 = arith.constant 8 : index
      %137 = vector.load %arg20[%c0_109, %c8_110] : memref<8x32xf32, #tpu.memory_space<vmem>>, vector<8x8xf32>
      %138 = vector.extract_strided_slice %131 {offsets = [0, 1], sizes = [8, 1], strides = [1, 1]} : vector<8x4xf32> to vector<8x1xf32>
      %139 = vector.broadcast %138 : vector<8x1xf32> to vector<8x8xf32>
      %140 = arith.mulf %137, %139 : vector<8x8xf32>
      %c0_111 = arith.constant 0 : index
      %c8_112 = arith.constant 8 : index
      %141 = vector.load %arg20[%c0_111, %c8_112] : memref<8x32xf32, #tpu.memory_space<vmem>>, vector<8x8xf32>
      tpu.vector_store %arg20[%c0_111, %c8_112], %140 {strides = array<i32>} : memref<8x32xf32, #tpu.memory_space<vmem>>, vector<8x8xf32>,
      %c0_113 = arith.constant 0 : index
      %c16_114 = arith.constant 16 : index
      %142 = vector.load %arg20[%c0_113, %c16_114] : memref<8x32xf32, #tpu.memory_space<vmem>>, vector<8x8xf32>
      %143 = vector.extract_strided_slice %131 {offsets = [0, 2], sizes = [8, 1], strides = [1, 1]} : vector<8x4xf32> to vector<8x1xf32>
      %144 = vector.broadcast %143 : vector<8x1xf32> to vector<8x8xf32>
      %145 = arith.mulf %142, %144 : vector<8x8xf32>
      %c0_115 = arith.constant 0 : index
      %c16_116 = arith.constant 16 : index
      %146 = vector.load %arg20[%c0_115, %c16_116] : memref<8x32xf32, #tpu.memory_space<vmem>>, vector<8x8xf32>
      tpu.vector_store %arg20[%c0_115, %c16_116], %145 {strides = array<i32>} : memref<8x32xf32, #tpu.memory_space<vmem>>, vector<8x8xf32>,
      %c0_117 = arith.constant 0 : index
      %c24_118 = arith.constant 24 : index
      %147 = vector.load %arg20[%c0_117, %c24_118] : memref<8x32xf32, #tpu.memory_space<vmem>>, vector<8x8xf32>
      %148 = vector.extract_strided_slice %131 {offsets = [0, 3], sizes = [8, 1], strides = [1, 1]} : vector<8x4xf32> to vector<8x1xf32>
      %149 = vector.broadcast %148 : vector<8x1xf32> to vector<8x8xf32>
      %150 = arith.mulf %147, %149 : vector<8x8xf32>
      %c0_119 = arith.constant 0 : index
      %c24_120 = arith.constant 24 : index
      %151 = vector.load %arg20[%c0_119, %c24_120] : memref<8x32xf32, #tpu.memory_space<vmem>>, vector<8x8xf32>
      tpu.vector_store %arg20[%c0_119, %c24_120], %150 {strides = array<i32>} : memref<8x32xf32, #tpu.memory_space<vmem>>, vector<8x8xf32>,
      %c0_121 = arith.constant 0 : index
      %c0_122 = arith.constant 0 : index
      %152 = vector.load %arg20[%c0_121, %c0_122] : memref<8x32xf32, #tpu.memory_space<vmem>>, vector<8x32xf32>
      %c0_123 = arith.constant 0 : index
      %c0_124 = arith.constant 0 : index
      %153 = vector.load %arg12[%c0_123, %c0_124] : memref<32x32xf32, #tpu.memory_space<vmem>>, vector<32x32xf32>
      %cst_125 = arith.constant dense<0.000000e+00> : vector<8x32xf32>
      %154 = tpu.matmul %152, %153, %cst_125 {dimension_numbers = #tpu.dot_dimension_numbers<[1], [0], [0], [1], [0, 0, 1, 1], [], []>} : vector<8x32xf32>, vector<32x32xf32>, vector<8x32xf32> -> vector<8x32xf32>
      %c0_126 = arith.constant 0 : index
      %c0_127 = arith.constant 0 : index
      %155 = vector.load %arg13[%c0_126, %c0_127] : memref<1x32xf32, #tpu.memory_space<vmem>>, vector<1x32xf32>
      %156 = vector.broadcast %155 : vector<1x32xf32> to vector<8x32xf32>
      %157 = arith.addf %154, %156 : vector<8x32xf32>
      %c0_128 = arith.constant 0 : index
      %c0_129 = arith.constant 0 : index
      %c0_130 = arith.constant 0 : index
      %158 = vector.load %arg14[%c0_128, %c0_129, %c0_130] : memref<1x8x32xf32, #tpu.memory_space<vmem>>, vector<1x8x32xf32>
      %159 = vector.shape_cast %158 : vector<1x8x32xf32> to vector<8x32xf32>
      %160 = vector.shape_cast %157 : vector<8x32xf32> to vector<1x8x32xf32>
      tpu.vector_store %arg14[%c0_128, %c0_129, %c0_130], %160 {strides = array<i32>} : memref<1x8x32xf32, #tpu.memory_space<vmem>>, vector<1x8x32xf32>,
    } else {
    }
    return
  }
  func.func @transform_0(%arg0: i32, %arg1: i32, %arg2: i32) -> (i32, i32, i32) {
    %c0_i32 = arith.constant 0 : i32
    %c0_i32_0 = arith.constant 0 : i32
    return %arg0, %arg1, %c0_i32 : i32, i32, i32
  }
  func.func @transform_1(%arg0: i32, %arg1: i32, %arg2: i32) -> (i32, i32, i32) {
    %c0_i32 = arith.constant 0 : i32
    %c0_i32_0 = arith.constant 0 : i32
    return %arg0, %arg2, %c0_i32 : i32, i32, i32
  }
  func.func @transform_2(%arg0: i32, %arg1: i32, %arg2: i32) -> (i32, i32, i32) {
    %c0_i32 = arith.constant 0 : i32
    %c0_i32_0 = arith.constant 0 : i32
    return %arg0, %arg2, %c0_i32 : i32, i32, i32
  }
  func.func @transform_3(%arg0: i32, %arg1: i32, %arg2: i32) -> (i32, i32) {
    %c0_i32 = arith.constant 0 : i32
    %c0_i32_0 = arith.constant 0 : i32
    %c0_i32_1 = arith.constant 0 : i32
    return %c0_i32, %c0_i32_0 : i32, i32
  }
  func.func @transform_4(%arg0: i32, %arg1: i32, %arg2: i32) -> (i32, i32) {
    %c0_i32 = arith.constant 0 : i32
    %c0_i32_0 = arith.constant 0 : i32
    %c0_i32_1 = arith.constant 0 : i32
    return %c0_i32, %c0_i32_0 : i32, i32
  }
  func.func @transform_5(%arg0: i32, %arg1: i32, %arg2: i32) -> (i32, i32) {
    %c0_i32 = arith.constant 0 : i32
    %c0_i32_0 = arith.constant 0 : i32
    %c0_i32_1 = arith.constant 0 : i32
    return %c0_i32, %c0_i32_0 : i32, i32
  }
  func.func @transform_6(%arg0: i32, %arg1: i32, %arg2: i32) -> (i32, i32) {
    %c0_i32 = arith.constant 0 : i32
    %c0_i32_0 = arith.constant 0 : i32
    %c0_i32_1 = arith.constant 0 : i32
    return %c0_i32, %c0_i32_0 : i32, i32
  }
  func.func @transform_7(%arg0: i32, %arg1: i32, %arg2: i32) -> (i32, i32) {
    %c0_i32 = arith.constant 0 : i32
    %c0_i32_0 = arith.constant 0 : i32
    %c0_i32_1 = arith.constant 0 : i32
    return %c0_i32, %c0_i32_0 : i32, i32
  }
  func.func @transform_8(%arg0: i32, %arg1: i32, %arg2: i32) -> (i32, i32) {
    %c0_i32 = arith.constant 0 : i32
    %c0_i32_0 = arith.constant 0 : i32
    %c0_i32_1 = arith.constant 0 : i32
    return %c0_i32, %c0_i32_0 : i32, i32
  }
  func.func @transform_9(%arg0: i32, %arg1: i32, %arg2: i32) -> (i32, i32) {
    %c0_i32 = arith.constant 0 : i32
    %c0_i32_0 = arith.constant 0 : i32
    %c0_i32_1 = arith.constant 0 : i32
    return %c0_i32, %c0_i32_0 : i32, i32
  }
  func.func @transform_10(%arg0: i32, %arg1: i32, %arg2: i32) -> (i32, i32) {
    %c0_i32 = arith.constant 0 : i32
    %c0_i32_0 = arith.constant 0 : i32
    %c0_i32_1 = arith.constant 0 : i32
    return %c0_i32, %c0_i32_0 : i32, i32
  }
  func.func @transform_11(%arg0: i32, %arg1: i32, %arg2: i32) -> (i32, i32, i32) {
    %c0_i32 = arith.constant 0 : i32
    %c0_i32_0 = arith.constant 0 : i32
    return %arg0, %arg1, %c0_i32 : i32, i32, i32
  }
}

</mosaic_0001>

<bundles_post_ra>
// kernel: tpu_custom_call.1
= control target key start
LH: loop header
LB: loop body
LE: loop exit
PB: predicated region body
PF: predicated region fallthrough
CT: control target
= control target key end

     0   :  { %s3195_s0 = inlined_call_operand.hbm [shape: f32[2,8,32], index: 0, kind: input, shape index: {}]   ;;  %s3196_s1 = inlined_call_operand.hbm [shape: f32[2,16,32], index: 1, kind: input, shape index: {}]   ;;  %s3197_s2 = inlined_call_operand.hbm [shape: f32[2,16,32], index: 2, kind: input, shape index: {}]   ;;  %s3198_s3 = inlined_call_operand.hbm [shape: f32[32,32], index: 3, kind: input, shape index: {}]   ;;  %s3199_s4 = inlined_call_operand.vmem [shape: f32[1,32], index: 4, kind: input, shape index: {}]   ;;  %s3200_s5 = inlined_call_operand.hbm [shape: f32[32,32], index: 5, kind: input, shape index: {}]   ;;  %s3201_s6 = inlined_call_operand.vmem [shape: f32[1,32], index: 6, kind: input, shape index: {}]   ;;  %s3202_s7 = inlined_call_operand.hbm [shape: f32[32,32], index: 7, kind: input, shape index: {}]   ;;  %s3203_s8 = inlined_call_operand.vmem [shape: f32[1,32], index: 8, kind: input, shape index: {}]   ;;  %s3204_s9 = inlined_call_operand.hbm [shape: f32[32,32], index: 9, kind: input, shape index: {}]   ;;  %s3205_s10 = inlined_call_operand.vmem [shape: f32[1,32], index: 10, kind: input, shape index: {}]   ;;  %s3206_s11 = inlined_call_operand.hbm [shape: f32[2,8,32], index: 11, kind: output, shape index: {}]  }
   0x1   :  { %3226 = sst [smem:[#allocation37_spill]] %s3196_s1 }
   0x2   :  { %3227 = sst [smem:[#allocation38_spill]] %s3198_s3 }
   0x3   :  { %3228 = sst [smem:[#allocation39_spill]] %s3199_s4 }
   0x4   :  { %3229 = sst [smem:[#allocation40_spill]] %s3200_s5 }
   0x5   :  { %3230 = sst [smem:[#allocation41_spill]] %s3201_s6 }
   0x6   :  { %3231 = sst [smem:[#allocation42_spill]] %s3202_s7 }
   0x7   :  { %3232 = sst [smem:[#allocation43_spill]] %s3203_s8 }
   0x8   :  { %3233 = sst [smem:[#allocation44_spill]] %s3204_s9 }
   0x9   :  { %3234 = sst [smem:[#allocation45_spill]] %s3205_s10 }
   0xa   :  { %3235 = sst [smem:[#allocation46_spill]] %s3206_s11 }
   0xb   :  { %16 = vsyncpa [#allocation9], 0 }
   0xc   :  { %18 = vsyncpa [#allocation9 + $0x1], 0 }
   0xd   :  { %19 = vsyncpa [#allocation12], 0 }
   0xe   :  { %21 = vsyncpa [#allocation12 + $0x1], 0 }
   0xf   :  { %22 = vsyncpa [#allocation15], 0 }
  0x10   :  { %23 = vsyncpa [#allocation18], 0 }
  0x11   :  { %24 = vsyncpa [#allocation10], 0 }
  0x12   :  { %26 = vsyncpa [#allocation10 + $0x1], 0  ;;  %s2718_s17 = smov 0   ;;  %s2720_s18 = smov 0  }
  0x13   :  { %s2722_s19 = smov 0   ;;  %s2724_s20 = smov 0  }
  0x14   :  { %s2726_s21 = smov 0   ;;  %s2728_s22 = smov 0  }
  0x15   :  { %s2730_s23 = smov 0   ;;  %s2732_s24 = smov 0  }
  0x16   :  { %s2734_s25 = smov 0   ;;  %s2736_s26 = smov 0  }
  0x17   :  { %s2738_s27 = smov 0  }
  0x18 LB: > { %3236 = sst [smem:[#allocation26_spill]] %s2589_s18  ;;  %s2774_s28 = sadd.s32 4294967295, %s2625_s27   ;;  %s2625_s27 = sphi %s2738_s27, %s32_s27   ;;  %s2621_s26 = sphi %s2736_s26, %s3294_s26   ;;  %s2617_s25 = sphi %s2734_s25, %s3293_s25   ;;  %s2613_s24 = sphi %s2732_s24, %s3292_s24   ;;  %s2609_s23 = sphi %s2730_s23, %s3291_s23   ;;  %s2605_s22 = sphi %s2728_s22, %s3290_s22   ;;  %s2601_s21 = sphi %s2726_s21, %s3298_s21   ;;  %s2597_s20 = sphi %s2724_s20, %s3297_s20   ;;  %s2593_s19 = sphi %s2722_s19, %s3296_s19   ;;  %s2589_s18 = sphi %s2720_s18, %s3295_s18   ;;  %s2585_s17 = sphi %s2718_s17, %s3287_s17  }
  0x19   : > { %3237 = sst [smem:[#allocation27_spill]] %s2605_s22  ;;  %p1928_p0 = scmp.ge.s32.totalorder %s2625_s27, 1 }
  0x1a   : > { %3238 = sst [smem:[#allocation28_spill]] %s2609_s23  ;;  %p3218_p1 = scmp.eq.s32.totalorder %s2774_s28, 0 }
  0x1b   : > { %3239 = sst [smem:[#allocation29_spill]] %s2613_s24  ;;  %p336_p2 = scmp.lt.s32.totalorder %s2625_s27, 5 }
  0x1c   : > { %3240 = sst [smem:[#allocation30_spill]] %s2617_s25  ;;  %s2627_s30 = smov [#allocation14]  }
  0x1d   : > { %3241 = sst [smem:[#allocation31_spill]] %s2621_s26  ;;  %p2779_p3 = pnand %p1928_p0, %p336_p2 }
  0x1e   : > { %s348_s12 = sshll.u32 %s2627_s30, 4  ;;  %s2628_s14 = smov [#allocation17]   ;;  %s349_s12 = int_to_ptr.vmem [resolvable:$true] %s348_s12 }
  0x1f   : > { %p2121_p4 = pneg %p2779_p3  ;;  %s380_s15 = sshll.u32 %s2628_s14, 4  ;;  %s381_s15 = int_to_ptr.vmem [resolvable:$true] %s380_s15 }
  0x20   : > { %s2316_s16 = scalar_lea.vmem %s349_s12, 512  ;;  %p2324_p10 = scmp.lt.s32.totalorder %s349_s12, %s349_s12 }
  0x21   : > { %p2787_p5 = pnand %p2121_p4, %p3218_p1  ;;  %p2317_p7 = scmp.ne.s32.totalorder %s349_s12, %s2316_s16 }
  0x22   : > { %p2325_p11 = scmp.lt.s32.totalorder %s2316_s16, %s2316_s16 }
  0x23   : > { %p2307_p6 = pneg %p2787_p5 }
  0x24   : > { %p2326_p12 = por %p2325_p11, %p2324_p10 }
  0x25   : > { %p2319_p8 = pnand %p2317_p7, %p2307_p6 }
  0x27   : > { %p2320_p9 = pneg %p2319_p8 }
  0x29   : > { %p2327_p13 = pnand %p2326_p12, %p2320_p9 }
  0x2b   : > { %2330 = shalt.err (!%p2327_p13)
}
  0x2c   : > { %s3208_s30 = smov 128   ;;  %s3210_s11 = smov 8  }
  0x2d   : > { %s3244_s3 = sld [smem:[#allocation38_spill]]  ;;  %s2342_s10 = scalar_lea.vmem %s381_s15, 512 }
  0x2e   : > { %p2343_p0 = scmp.ne.s32.totalorder %s381_s15, %s2342_s10  ;;  %p2350_p7 = scmp.lt.s32.totalorder %s381_s15, %s381_s15 }
  0x2f   : > { %p2351_p8 = scmp.lt.s32.totalorder %s2342_s10, %s2342_s10 }
  0x30   : > { %p2345_p2 = pnand %p2343_p0, %p2307_p6 }
  0x31   : > { %p2352_p9 = por %p2351_p8, %p2350_p7 }
  0x32   : > { %p2346_p4 = pneg %p2345_p2 }
  0x33   : > { %2124 = dma.hbm_to_vmem [thread:$0]  (!%p2787_p5), %s3244_s3, 512, %s349_s12, [#allocation15], %s3208_s30, %s3208_s30, %s3210_s11  }
  0x34   : > { %p2353_p10 = pnand %p2352_p9, %p2346_p4 }
  0x36   : > { %2356 = shalt.err (!%p2353_p10)
}
  0x37   : > { %s3245_s7 = sld [smem:[#allocation42_spill]]  ;;  %s44_s10 = sadd.s32 1, %s2617_s25 }
  0x38   : > { %p45_p11 = scmp.ge.s32.totalorder %s44_s10, 2  ;;  %s51_s8 = sadd.s32 1, %s2621_s26 }
  0x39   : > { %p3219_p12 = scmp.eq.s32.totalorder %s2625_s27, 0  ;;  %p95_p13 = scmp.ne.s32.totalorder %s2593_s19, %s2589_s18 }
  0x3a   : > { %s3300_s10 = smov (%p45_p11, %s44_s10), 0  ;;  %s3302_s8 = smov (!%p45_p11, %s51_s8), %s2621_s26 }
  0x3b   : > { %3246 = sst [smem:[#allocation32_spill]] %s3300_s10  ;;  %s84_s24 = ssub.s32 %s2617_s25, %s3300_s10 }
  0x3c   : > { %s88_s12 = sadd.s32 1, %s2593_s19  ;;  %p53_p0 = scmp.ge.s32.totalorder %s3302_s8, 2 }
  0x3d   : > { %2130 = dma.hbm_to_vmem [thread:$0]  (!%p2787_p5), %s3245_s7, 512, %s381_s15, [#allocation18], %s3208_s30, %s3208_s30, %s3210_s11  }
  0x3e   : > { %p101_p2 = scmp.ne.s32.totalorder %s2589_s18, %s2585_s17  ;;  %p2830_p4 = por %p95_p13, %p3219_p12 }
  0x3f   : > { %s432_s14 = sand.u32 1, %s2625_s27   ;;  %s3304_s8 = smov (%p53_p0, %s3302_s8), 0 }
  0x40   : > { %3248 = sst [smem:[#allocation33_spill]] %s3304_s8  ;;  %p2839_p7 = por %p101_p2, %p3218_p1 }
  0x41   : > { %p3217_p8 = scmp.lt.s32.totalorder %s2625_s27, 4  ;;  %s2846_s30 = ssub.s32 %s2621_s26, %s3304_s8 }
  0x42   : > { %s3249_s16 = scalar_select %p2839_p7, 1, 0 }
  0x43   : > { %s434_s17 = sand.u32 1, %s2593_s19   ;;  %s85_s11 = sor.u32 %s84_s24, %s2846_s30 }
  0x44   : > { %3250 = sst [smem:[#allocation34_spill]] %s3249_s16  ;;  %p86_p9 = scmp.eq.s32.totalorder %s85_s11, 0 }
  0x45   : > { %s2850_s3 = sshll.u32 %s434_s17, 3  ;;  %s1937_s7 = sshll.u32 %s2621_s26, 1 }
  0x46   : > { %s2854_s10 = scalar_select %p86_p9, %s2593_s19, %s88_s12  }
  0x47   : > { %s2857_s6 = sadd.s32 %s2617_s25, %s1937_s7  ;;  %s436_s4 = scalar_lea.vmem [#allocation11], %s2850_s3 }
  0x48   : > { %3251 = sst [smem:[#allocation35_spill]] %s2854_s10  ;;  %s445_s23 = sshll.u32 %s436_s4, 4  ;;  %s446_s23 = int_to_ptr.vmem [resolvable:$true] %s445_s23 }
  0x49   : > { %s3220_s16 = sshll.u32 %s2857_s6, 7  ;;  %s3252_s1 = sld [smem:[#allocation37_spill]] }
  0x4a   : > { %p2870_p10 = pnand %p3217_p8, %p2830_p4  ;;  %s2875_s7 = scalar_lea.sflag [#allocation12], %s432_s14 }
  0x4b   : > { %s2370_s4 = scalar_lea.vmem %s446_s23, 128  ;;  %s2631_s18 = smov [#allocation11]  }
  0x4c   : > { %p3221_p13 = pneg %p2870_p10  ;;  %p2371_p0 = scmp.ne.s32.totalorder %s446_s23, %s2370_s4 }
  0x4d   : > { %s2375_s8 = sshll.u32 %s2631_s18, 4  ;;  %s2376_s8 = int_to_ptr.vmem [resolvable:$false] %s2375_s8 }
  0x4e   : > { %p2373_p2 = pnand %p2371_p0, %p3221_p13  ;;  %s2377_s12 = scalar_lea.vmem %s2376_s8, 256 }
  0x4f   : > { %s443_s24 = scalar_lea.hbm %s3252_s1, %s3220_s16  ;;  %p2378_p4 = scmp.lt.s32.totalorder %s446_s23, %s2376_s8 }
  0x50   : > { %p2374_p9 = pneg %p2373_p2  ;;  %p2379_p8 = scmp.lt.s32.totalorder %s2377_s12, %s2370_s4 }
  0x52   : > { %p2380_p1 = por %p2379_p8, %p2378_p4 }
  0x54   : > { %p2381_p12 = pnand %p2380_p1, %p2374_p9 }
  0x56   : > { %2384 = shalt.err (!%p2381_p12)
}
  0x57   : > { %2140 = dma.hbm_to_vmem [thread:$0]  (!%p2870_p10), %s443_s24, 128, %s446_s23, %s2875_s7  }
  0x58   : > { %s2632_s15 = smov [#allocation16]   ;;  %s2633_s17 = smov [#allocation19]  }
  0x59   : > { %s364_s14 = sshll.u32 %s2632_s15, 4  ;;  %s396_s16 = sshll.u32 %s2633_s17, 4  ;;  %s365_s14 = int_to_ptr.vmem [resolvable:$true] %s364_s14  ;;  %s397_s16 = int_to_ptr.vmem [resolvable:$true] %s396_s16 }
  0x5a   : > { %s2396_s1 = scalar_lea.vmem %s365_s14, 512  ;;  %p2404_p11 = scmp.lt.s32.totalorder %s365_s14, %s365_s14 }
  0x5b   : > { %p2397_p0 = scmp.ne.s32.totalorder %s365_s14, %s2396_s1  ;;  %p2405_p8 = scmp.lt.s32.totalorder %s2396_s1, %s2396_s1 }
  0x5d   : > { %p2399_p2 = pnand %p2397_p0, %p2307_p6  ;;  %p2406_p1 = por %p2405_p8, %p2404_p11 }
  0x5f   : > { %p2400_p13 = pneg %p2399_p2 }
  0x61   : > { %p2407_p12 = pnand %p2406_p1, %p2400_p13 }
  0x63   : > { %2410 = shalt.err (!%p2407_p12)
}
  0x64   : > { %s3254_s4 = smov 8   ;;  %s3255_s23 = smov 128  }
  0x65   : > { %s3256_s5 = sld [smem:[#allocation40_spill]]  ;;  %s2422_s8 = scalar_lea.vmem %s397_s16, 512 }
  0x66   : > { %p2423_p9 = scmp.ne.s32.totalorder %s397_s16, %s2422_s8  ;;  %p2430_p11 = scmp.lt.s32.totalorder %s397_s16, %s397_s16 }
  0x67   : > { %p2431_p13 = scmp.lt.s32.totalorder %s2422_s8, %s2422_s8 }
  0x68   : > { %p2425_p4 = pnand %p2423_p9, %p2307_p6 }
  0x69   : > { %p2432_p2 = por %p2431_p13, %p2430_p11 }
  0x6a   : > { %p2426_p0 = pneg %p2425_p4 }
  0x6b   : > { %2127 = dma.hbm_to_vmem [thread:$0]  (!%p2787_p5), %s3256_s5, 512, %s365_s14, [#allocation15], %s3255_s23, %s3255_s23, %s3254_s4  }
  0x6c   : > { %p2433_p8 = pnand %p2432_p2, %p2426_p0 }
  0x6e   : > { %2436 = shalt.err (!%p2433_p8)
}
  0x6f   : > { %s3257_s9 = sld [smem:[#allocation44_spill]]  ;;  %s1927_s13 = sadd.s32 4294967294, %s2625_s27  }
  0x70   : > { %s60_s15 = sadd.s32 1, %s2605_s22  ;;  %p67_p6 = scmp.ne.s32.totalorder %s2605_s22, %s2601_s21 }
  0x71   : > { %p3258_p1 = scmp.eq.s32.totalorder %s2846_s30, 0  ;;  %p3260_p12 = scmp.eq.s32.totalorder %s2625_s27, 0 }
  0x72   : > { %p73_p4 = scmp.ne.s32.totalorder %s2601_s21, %s2597_s20  ;;  %p323_p0 = scmp.eq.s32.totalorder %s2774_s28, 3 }
  0x73   : > { %s2914_s14 = scalar_select %p3258_p1, %s2605_s22, %s60_s15  }
  0x74   : > { %p2918_p9 = por %p3260_p12, %p67_p6  ;;  %p329_p11 = scmp.eq.s32.totalorder %s1927_s13, 3 }
  0x75   : > { %2133 = dma.hbm_to_vmem [thread:$0]  (!%p2787_p5), %s3257_s9, 512, %s397_s16, [#allocation18], %s3255_s23, %s3255_s23, %s3254_s4  }
  0x76   : > { %3259 = sst [smem:[#allocation36_spill]] %s2914_s14  ;;  %p3262_p13 = scmp.eq.s32.totalorder %s2774_s28, 0 }
  0x77   : > { %s413_s30 = sand.u32 1, %s2605_s22   ;;  %p2932_p2 = por %p323_p0, %p67_p6 }
  0x78   : > { %p2927_p5 = por %p3262_p13, %p73_p4  ;;  %p2936_p8 = por %p329_p11, %p73_p4 }
  0x79   : > { %s3264_s4 = scalar_select %p2932_p2, 1, 0 }
  0x7a   : > { %s3265_s23 = scalar_select %p2936_p8, 1, 0 }
  0x7b   : > { %s1934_s24 = sshll.u32 %s413_s30, 3  ;;  %s1935_s18 = sshll.u32 %s2621_s26, 7 }
  0x7c   : > { %s423_s12 = scalar_lea.hbm %s3195_s0, %s1935_s18  ;;  %s417_s13 = scalar_lea.vmem [#allocation8], %s1934_s24 }
  0x7d   : > { %s425_s15 = sshll.u32 %s417_s13, 4  ;;  %p3266_p1 = scmp.lt.s32.totalorder %s2625_s27, 4  ;;  %s426_s15 = int_to_ptr.vmem [resolvable:$true] %s425_s15 }
  0x7e   : > { %s3268_s9 = sshll.u32 %s2857_s6, 7  ;;  %s456_s26 = scalar_lea.vmem [#allocation13], %s2850_s3 }
  0x7f   : > { %p2948_p12 = pnand %p3266_p1, %p2918_p9  ;;  %s2957_s22 = scalar_lea.hbm %s3197_s2, %s3268_s9 }
  0x80   : > { %s465_s10 = sshll.u32 %s456_s26, 4  ;;  %s414_s24 = scalar_lea.sflag [#allocation9], %s413_s30  ;;  %s2960_s10 = int_to_ptr.vmem [resolvable:$true] %s465_s10 }
  0x81   : > { %p2439_p6 = pneg %p2948_p12  ;;  %s2450_s17 = scalar_lea.vmem %s426_s15, 128 }
  0x82   : > { %p2451_p4 = scmp.ne.s32.totalorder %s426_s15, %s2450_s17  ;;  %s2634_s18 = smov [#allocation8]  }
  0x83   : > { %s2455_s8 = sshll.u32 %s2634_s18, 4  ;;  %s2456_s8 = int_to_ptr.vmem [resolvable:$false] %s2455_s8 }
  0x84   : > { %p2453_p9 = pnand %p2451_p4, %p2439_p6  ;;  %s2457_s6 = scalar_lea.vmem %s2456_s8, 256 }
  0x85   : > { %p2458_p11 = scmp.lt.s32.totalorder %s426_s15, %s2456_s8  ;;  %p2459_p13 = scmp.lt.s32.totalorder %s2457_s6, %s2450_s17 }
  0x86   : > { %p2454_p0 = pneg %p2453_p9 }
  0x87   : > { %p2460_p1 = por %p2459_p13, %p2458_p11 }
  0x89   : > { %p2461_p8 = pnand %p2460_p1, %p2454_p0 }
  0x8b   : > { %2464 = shalt.err (!%p2461_p8)
}
  0x8c   : > { %2137 = dma.hbm_to_vmem [thread:$0]  (!%p2948_p12), %s423_s12, 128, %s426_s15, %s414_s24  }
  0x8d   : > { %s2478_s3 = scalar_lea.vmem %s2960_s10, 128  ;;  %p3269_p6 = pneg %p2870_p10 }
  0x8e   : > { %p2479_p2 = scmp.ne.s32.totalorder %s2960_s10, %s2478_s3  ;;  %s2635_s9 = smov [#allocation13]  }
  0x8f   : > { %s2483_s25 = sshll.u32 %s2635_s9, 4  ;;  %s2484_s25 = int_to_ptr.vmem [resolvable:$false] %s2483_s25 }
  0x90   : > { %p2481_p4 = pnand %p2479_p2, %p3269_p6  ;;  %s2485_s26 = scalar_lea.vmem %s2484_s25, 256 }
  0x91   : > { %p2486_p11 = scmp.lt.s32.totalorder %s2960_s10, %s2484_s25  ;;  %p2487_p0 = scmp.lt.s32.totalorder %s2485_s26, %s2478_s3 }
  0x92   : > { %p2482_p9 = pneg %p2481_p4 }
  0x93   : > { %p2488_p8 = por %p2487_p0, %p2486_p11 }
  0x95   : > { %p2489_p13 = pnand %p2488_p8, %p2482_p9 }
  0x97   : > { %2492 = shalt.err (!%p2489_p13)
}
  0x98   : > { %2143 = dma.hbm_to_vmem [thread:$0]  (!%p2870_p10), %s2957_s22, 128, %s2960_s10, %s2875_s7  }
  0x99   : > { %474 = sbr.rel (%p2779_p3) target bundleno = 1990 (0x7c6), region = 64  ;;  %s2980_s5 = sand.u32 (!%p2779_p3), 1, %s2601_s21  }
  0x9a   : > { %s1943_s14 = sshll.u32 (!%p2779_p3), %s2980_s5, 3  ;;  %s477_s30 = scalar_lea.sflag (!%p2779_p3), [#allocation9], %s2980_s5 }
  0x9b   : > { %s2984_s1 = scalar_lea.vmem (!%p2779_p3), [#allocation8], %s1943_s14 }
  0x9e   : > { %2564 = dma.done.wait (%p2927_p5), %s477_s30, 128  }
  0x9f   : > { %2566 = vsyncadd (%p2927_p5), %s477_s30, 4294967168  ;;  %s3270_s22 = sld [smem:[#allocation26_spill]]  ;;  %s485_s29 = sand.u32 1, %s2774_s28  }
  0xa0   : > { %s486_s12 = scalar_lea.sflag [#allocation12], %s485_s29 }
  0xa5   : > { %s487_s11 = sand.u32 1, %s3270_s22  }
  0xa6   : > { %s2992_s7 = sshll.u32 %s487_s11, 3 }
  0xa7   : > { %s489_s13 = scalar_lea.vmem [#allocation11], %s2992_s7 }
  0xa8   : > { %2568 = dma.done.wait (%p2839_p7), %s486_s12, 256  }
  0xa9   : > { %2570 = vsyncadd (%p2839_p7), %s486_s12, 4294967040  ;;  %s498_s15 = scalar_lea.vmem [#allocation13], %s2992_s7  ;;  %p3272_p3 = scmp.eq.s32.totalorder %s2774_s28, 0 }
  0xab   : > { %2572 = dma.done.wait (%p3272_p3), [#allocation15], 1024   ;;  %p3273_p10 = pmov %p3272_p3 }
  0xac   : > { %p3274_p5 = pmov %p3272_p3 }
  0xad   : > { %2574 = vsyncadd (%p3273_p10), [#allocation15], 4294966272 }
  0xae   : > { %2576 = dma.done.wait (%p3274_p5), [#allocation18], 1024   ;;  %p3275_p2 = pmov %p3272_p3 }
  0xaf   : > { %s3008_s16 = scalar_lea.vmem [#allocation20], %s1943_s14  ;;  %s3276_s24 = sld [smem:[#allocation28_spill]] }
  0xb0   : > { %2578 = vsyncadd (%p3275_p2), [#allocation18], 4294966272 }
  0xb5   : > { %p1951_p12 = scmp.ne.s32.totalorder %s3276_s24, 0 }
  0xb6   : > { %s3277_s18 = sld [smem:[#allocation39_spill]] (!%p1951_p12) }
  0xb7   : > { %566 = sbr.rel (%p1951_p12) target bundleno = 395 (0x18b), region = 96 }
  0xbc   : > { %vm655_vm0 = vcmask 31744   ;;  %v571_v0 = vld [vmem:[#allocation14 + $0x18] sm:$0xff]  ;;  %v2636_v1 = vmov 0.0   ;;  %v2637_v2 = vmov -inf   ;;  %v570_v3 = vld [vmem:[#allocation14 + $0x10] sm:$0xff]  ;;  %vm579_vm1 = vcmask 261120  }
  0xbd   : > { %2013 = vmatprep.subr.mxu0 %v2636_v1  ;;  %656 = vst.msk [vmem:[#allocation5] sm:$0xff] %vm655_vm0, %v2637_v2  ;;  %657 = vst.msk [vmem:[#allocation6] sm:$0xff] %vm655_vm0, %v2636_v1  ;;  %vm2638_vm2 = vmmov 0   ;;  %v569_v4 = vld [vmem:[#allocation14 + $0x8] sm:$0xff]  ;;  %v568_v5 = vld [vmem:[#allocation14] sm:$0xff] }
  0xbe   : > { %2014 = vmatpush3.msra.mxu0 %v571_v0  ;;  %2021 = vmatprep.mubr.msk.f32.mxu0 %vm2638_vm2, %v2636_v1  ;;  %658 = vst.msk [vmem:[#allocation7] sm:$0xff] %vm579_vm1, %v2636_v1  ;;  %v567_v6 = vld [vmem:[%s2984_s1] sm:$0xff]  ;;  %v1952_v7 = vld [vmem:[%s3277_s18] ss:$0 sm:$0xff] }
  0xbf   : > { %2015 = vmatprep.subr.mxu0 %v2636_v1 }
  0xc0   : > { %2016 = vmatpush3.msra.mxu0 %v570_v3 }
  0xc1   : > { %2017 = vmatprep.subr.mxu0 %v2636_v1 }
  0xc2   : > { %2018 = vmatpush3.msra.mxu0 %v569_v4 }
  0xc3   : > { %2019 = vmatprep.subr.mxu0 %v2636_v1 }
  0xc4   : > { %2020 = vmatpush3.msra.mxu0 %v568_v5 }
  0xc5   : > { %2022 = vmatmul.mubr.msk.f32.vlgmr.msra.gmra.mxu0 %vm579_vm1, %v567_v6 }
 0x185   : > { %v649_v8 = vpop.f32.mrf.mxu0 }
 0x186   : > { %v650_v9 = vadd.f32 %v1952_v7, %v649_v8 }
 0x187   : > { %v2023_v10 = vpop.f32.mrf.mxu0 }
 0x188   : > { %v653_v11 = vmul.f32 0.35355338, %v650_v9 }
 0x18a   : > { %654 = vst.msk [vmem:[#allocation2] sm:$0xff] %vm579_vm1, %v653_v11 }
 0x18b PF: > { %v664_v12 = vld [vmem:[#allocation16 + $0x18] sm:$0xff]  ;;  %v2639_v13 = vmov 0.0   ;;  %v663_v14 = vld [vmem:[#allocation16 + $0x10] sm:$0xff]  ;;  %vm2640_vm3 = vmmov 0   ;;  %v662_v15 = vld [vmem:[#allocation16 + $0x8] sm:$0xff]  ;;  %vm672_vm4 = vcmask 261120  }
 0x18c   : > { %2024 = vmatprep.subr.mxu0 %v2639_v13  ;;  %2032 = vmatprep.mubr.msk.f32.mxu0 %vm2640_vm3, %v2639_v13  ;;  %v661_v16 = vld [vmem:[#allocation16] sm:$0xff]  ;;  %s3278_s3 = sld [smem:[#allocation41_spill]]  ;;  %vm835_vm5 = vcmask 64512   ;;  %s2641_s9 = smov 112   ;;  %v750_v24 = vld [vmem:[#allocation17 + $0x18] sm:$0xff]  ;;  %v749_v25 = vld [vmem:[#allocation17 + $0x10] sm:$0xff] }
 0x18d   : > { %2025 = vmatpush3.msra.mxu0 %v664_v12  ;;  %2035 = vmatprep.subr.mxu1 %v2639_v13  ;;  %v659_v17 = vld [vmem:[%s489_s13] sm:$0xff]  ;;  %s2642_s25 = smov 120   ;;  %s2643_s26 = smov 104   ;;  %v660_v28 = vld [vmem:[%s498_s15] sm:$0xff]  ;;  %v2644_v38 = vmov 0   ;;  %v2645_v48 = vmov 1  }
 0x18e   : > { %2026 = vmatprep.subr.mxu0 %v2639_v13  ;;  %2043 = vmatprep.mubr.msk.f32.mxu1 %vm2640_vm3, %v2639_v13  ;;  %v748_v26 = vld [vmem:[#allocation17 + $0x8] sm:$0xff]  ;;  %v747_v27 = vld [vmem:[#allocation17] sm:$0xff]  ;;  %s3279_s1 = sld [smem:[#allocation43_spill]]  ;;  %v912_v53 = vld [vmem:[#allocation5] sm:$0xff]  ;;  %vm934_vm6 = vcmask 7168   ;;  %v2646_v58 = vmov 2  }
 0x18f   : > { %2027 = vmatpush3.msra.mxu0 %v663_v14  ;;  %2036 = vmatpush3.msra.mxu1 %v750_v24  ;;  %vm1124_vm7 = vcmask 15368   ;;  %vm1323_vm8 = vcmask 23568   ;;  %v2647_v10 = vmov 3   ;;  %vm1522_vm9 = vcmask 31768   ;;  %s2648_s22 = smov 8   ;;  %s2649_s10 = smov 16  }
 0x190   : > { %2028 = vmatprep.subr.mxu0 %v2639_v13  ;;  %2037 = vmatprep.subr.mxu1 %v2639_v13  ;;  %s2650_s29 = smov 24   ;;  %vm1216_vm10 = vcmask 130112   ;;  %vm1415_vm11 = vcmask 195712   ;;  %vm1614_vm12 = vcmask 261312   ;;  %s3280_s11 = sld [smem:[#allocation28_spill]] }
 0x191   : > { %2029 = vmatpush3.msra.mxu0 %v662_v15  ;;  %v832_v23 = vld [vmem:[#allocation2] sm:$0xff]  ;;  %2038 = vmatpush3.msra.mxu1 %v749_v25 }
 0x192   : > { %2030 = vmatprep.subr.mxu0 %v2639_v13  ;;  %v1954_v18 = vld [vmem:[%s3278_s3] ss:$0 sm:$0xff]  ;;  %2039 = vmatprep.subr.mxu1 %v2639_v13 }
 0x193   : > { %2031 = vmatpush3.msra.mxu0 %v661_v16  ;;  %2040 = vmatpush3.msra.mxu1 %v748_v26 }
 0x194   : > { %2033 = vmatmul.mubr.msk.f32.vlgmr.msra.gmra.mxu0 %vm672_vm4, %v659_v17  ;;  %2046 = vmatprep.subr.mxu0 %v2639_v13  ;;  %v1956_v49 = vld [vmem:[%s3279_s1] ss:$0 sm:$0xff] }
 0x195   : > { %2048 = vmatprep.mubr.msk.f32.mxu0 %vm2640_vm3, %v2639_v13  ;;  %2041 = vmatprep.subr.mxu1 %v2639_v13 }
 0x196   : > { %2042 = vmatpush3.msra.mxu1 %v747_v27  ;;  %2273 = vset.pattern.permute.xlu1 %v2644_v38  ;;  %p1970_p7 = scmp.ne.s32.totalorder %s3280_s11, 1 }
 0x197   : > { %2044 = vmatmul.mubr.msk.f32.vlgmr.msra.gmra.mxu1 %vm672_vm4, %v660_v28  ;;  %2051 = vmatprep.subr.mxu1 %v2639_v13  ;;  %s3281_s13 = sld [smem:[#allocation45_spill]] (!%p1970_p7) }
 0x198   : > { %2053 = vmatprep.mubr.msk.f32.mxu1 %vm2640_vm3, %v2639_v13  ;;  %2274 = vset.pattern.permute.xlu0 %v2645_v48 }
 0x254   : > { %v742_v19 = vpop.f32.mrf.mxu0 }
 0x255   : > { %v743_v20 = vadd.f32 %v1954_v18, %v742_v19 }
 0x256   : > { %v2034_v21 = vpop.f32.mrf.mxu0 }
 0x257   : > { %746 = vst.msk [vmem:[#allocation3] sm:$0xff] %vm672_vm4, %v743_v20  ;;  %v827_v50 = vpop.f32.mrf.mxu1 }
 0x258   : > { %v828_v51 = vadd.f32 %v1956_v49, %v827_v50 }
 0x259   : > { %v2045_v52 = vpop.f32.mrf.mxu1 }
 0x25a   : > { %831 = vst.msk [vmem:[#allocation4] sm:$0xff] %vm672_vm4, %v828_v51 }
 0x25e   : > { %v1219_v22 = vld [vmem:[#allocation3] sm:$0xff] }
 0x25f   : > { %1225 = vrot.lane.b32.xlu1 %v1219_v22, %s2641_s9  ;;  %1026 = vrot.lane.b32.xlu0 %v1219_v22, %s2642_s25 }
 0x260   : > { %2047 = vmatpush3.xpose.msk.msra.mxu0 %vm835_vm5, %v1219_v22 }
 0x261   : > { %2056 = vmatprep.subr.mxu0 %v2639_v13  ;;  %v834_v57 = vld [vmem:[#allocation4] sm:$0xff] }
 0x262   : > { %2052 = vmatpush3.msra.mxu1 %v834_v57 }
 0x263   : > { %2049 = vmatmul.mubr.msk.f32.vlgmr.msra.gmra.mxu0 %vm835_vm5, %v832_v23  ;;  %1023 = vrot.lane.b32.xlu0 %v832_v23, %s2642_s25 }
 0x264   : > { %1222 = vrot.lane.b32.xlu1 %v832_v23, %s2641_s9  ;;  %2058 = vmatprep.mubr.msk.f32.mxu0 %vm2640_vm3, %v2639_v13 }
 0x265   : > { %2061 = vmatprep.subr.mxu1 %v2639_v13 }
 0x267   : > { %1424 = vrot.lane.b32.xlu0 %v1219_v22, %s2643_s26 }
 0x268   : > { %1421 = vrot.lane.b32.xlu1 %v832_v23, %s2643_s26 }
 0x2d1   : > { %v1027_v29 = vpop.permute.xlu0 %1026  ;;  %v1226_v30 = vpop.permute.xlu1 %1225 }
 0x2d2   : > { %2057 = vmatpush3.xpose.msk.msra.mxu0 %vm835_vm5, %v1027_v29 }
 0x2d3   : > { %2066 = vmatprep.subr.mxu0 %v2639_v13 }
 0x2d5   : > { %v1024_v31 = vpop.permute.xlu0 %1023 }
 0x2d6   : > { %2059 = vmatmul.mubr.msk.f32.vlgmr.msra.gmra.mxu0 %vm835_vm5, %v1024_v31  ;;  %v1223_v32 = vpop.permute.xlu1 %1222 }
 0x2d7   : > { %2067 = vmatpush3.xpose.msk.msra.mxu0 %vm835_vm5, %v1226_v30  ;;  %2068 = vmatprep.mubr.msk.f32.mxu0 %vm2640_vm3, %v2639_v13 }
 0x2d8   : > { %2076 = vmatprep.subr.mxu0 %v2639_v13 }
 0x2d9   : > { %v1425_v33 = vpop.permute.xlu0 %1424 }
 0x2da   : > { %2069 = vmatmul.mubr.msk.f32.vlgmr.msra.gmra.mxu0 %vm835_vm5, %v1223_v32  ;;  %v1422_v34 = vpop.permute.xlu1 %1421 }
 0x2db   : > { %2077 = vmatpush3.xpose.msk.msra.mxu0 %vm835_vm5, %v1425_v33  ;;  %2078 = vmatprep.mubr.msk.f32.mxu0 %vm2640_vm3, %v2639_v13 }
 0x2de   : > { %2079 = vmatmul.mubr.msk.f32.vlgmr.msra.gmra.mxu0 %vm835_vm5, %v1422_v34 }
 0x323   : > { %v908_v35 = vpop.f32.mrf.mxu0 }
 0x324   : > { %v914_v36 = vsel %vm835_vm5, %v908_v35, -inf }
 0x325   : > { %915 = vmax.xlane.f32.xlu0 %v914_v36  ;;  %v2050_v37 = vpop.f32.mrf.mxu0 }
 0x396   : > { %v3070_v39 = vpop.f32.mrf.mxu0 }
 0x397   : > { %v1104_v40 = vsel %vm835_vm5, %v3070_v39, -inf }
 0x398   : > { %1105 = vmax.xlane.f32.xlu1 %v1104_v40  ;;  %v2060_v41 = vpop.f32.mrf.mxu0 }
 0x39a   : > { %v3074_v42 = vpop.f32.mrf.mxu0 }
 0x39b   : > { %v1303_v43 = vsel %vm835_vm5, %v3074_v42, -inf }
 0x39c   : > { %v2070_v44 = vpop.f32.mrf.mxu0  ;;  %1304 = vmax.xlane.f32.xlu0 %v1303_v43  ;;  %v937_v43 = vld [vmem:[#allocation7] sm:$0xff] }
 0x39e   : > { %v3078_v45 = vpop.f32.mrf.mxu0 }
 0x39f   : > { %v1502_v46 = vsel %vm835_vm5, %v3078_v45, -inf }
 0x3a0   : > { %v2080_v47 = vpop.f32.mrf.mxu0  ;;  %1503 = vmax.xlane.f32.xlu0 %v1502_v46 }
 0x3ae   : > { %v916_v54 = vpop.xlane.xlu0 %915 }
 0x3af   : > { %v917_v55 = vmax.f32 %v912_v53, %v916_v54 }
 0x3b1   : > { %v918_v56 = vsub.f32 %v912_v53, %v917_v55  ;;  %936 = vst.msk [vmem:[#allocation5] sm:$0xff] %vm934_vm6, %v917_v55  ;;  %923 = vperm.xlu1 %2273, %v917_v55  }
 0x3b3   : > { %v919_v59 = vmul.f32 1.442695, %v918_v56 }
 0x3b5   : > { %2275 = vset.pattern.permute.xlu1 %v2646_v58  ;;  %2282 = vpow2.f32 %v919_v59 }
 0x3b8   : > { %v1102_v60 = vld [vmem:[#allocation5] sm:$0xff] }
 0x3c2   : > { %v3089_v0 = vpop.eup %2282 }
 0x421   : > { %v1106_v61 = vpop.xlane.xlu1 %1105 }
 0x422   : > { %v1107_v62 = vmax.f32 %v1102_v60, %v1106_v61 }
 0x424   : > { %v1108_v63 = vsub.f32 %v1102_v60, %v1107_v62  ;;  %1126 = vst.msk [vmem:[#allocation5] sm:$0xff] %vm1124_vm7, %v1107_v62  ;;  %1113 = vperm.xlu0 %2274, %v1107_v62  }
 0x425   : > { %v1305_v1 = vpop.xlane.xlu0 %1304 }
 0x426   : > { %v1109_v17 = vmul.f32 1.442695, %v1108_v63 }
 0x428   : > { %2277 = vset.pattern.permute.xlu0 %v2644_v38 }
 0x429   : > { %940 = vperm.xlu0 %2277, %v3089_v0   ;;  %v1504_v9 = vpop.xlane.xlu0 %1503 }
 0x42b   : > { %v1301_v2 = vld [vmem:[#allocation5] sm:$0xff] }
 0x42c   : > { %v924_v3 = vpop.permute.xlu1 %923  ;;  %v1306_v4 = vmax.f32 %v1301_v2, %v1305_v1 }
 0x42d   : > { %v926_v5 = vsub.f32 %v908_v35, %v924_v3  ;;  %2279 = vset.pattern.permute.xlu0 %v2646_v58 }
 0x42e   : > { %v1307_v6 = vsub.f32 %v1301_v2, %v1306_v4  ;;  %1325 = vst.msk [vmem:[#allocation5] sm:$0xff] %vm1323_vm8, %v1306_v4  ;;  %1312 = vperm.xlu1 %2275, %v1306_v4  }
 0x42f   : > { %v927_v7 = vmul.f32 1.442695, %v926_v5 }
 0x430   : > { %v1308_v8 = vmul.f32 1.442695, %v1307_v6 }
 0x431   : > { %2284 = vpow2.f32 %v927_v7 }
 0x432   : > { %2286 = vpow2.f32 %v1308_v8  ;;  %1135 = vrot.lane.b32.xlu1 %v834_v57, %s2642_s25 }
 0x433   : > { %2276 = vset.pattern.permute.xlu1 %v2647_v10  ;;  %2288 = vpow2.f32 %v1109_v17 }
 0x435   : > { %v1500_v11 = vld [vmem:[#allocation5] sm:$0xff] }
 0x436   : > { %v1505_v12 = vmax.f32 %v1500_v11, %v1504_v9 }
 0x438   : > { %v1506_v14 = vsub.f32 %v1500_v11, %v1505_v12  ;;  %1524 = vst.msk [vmem:[#allocation5] sm:$0xff] %vm1522_vm9, %v1505_v12  ;;  %1511 = vperm.xlu1 %2276, %v1505_v12  }
 0x43a   : > { %v1507_v35 = vmul.f32 1.442695, %v1506_v14 }
 0x43c   : > { %1334 = vrot.lane.b32.xlu1 %v834_v57, %s2641_s9 }
 0x43d   : > { %2278 = vset.pattern.permute.xlu1 %v2645_v48 }
 0x43e   : > { %v2285_v15 = vpop.eup %2284 }
 0x43f   : > { %v3096_v16 = vpop.eup %2286  ;;  %2054 = vmatmul.mubr.msk.f32.vlgmr.msra.gmra.mxu1 %vm835_vm5, %v2285_v15  ;;  %v930_v18 = vsel %vm835_vm5, %v2285_v15, 0.0 }
 0x440   : > { %1329 = vperm.xlu0 %2279, %v3096_v16   ;;  %1533 = vrot.lane.b32.xlu1 %v834_v57, %s2643_s26  ;;  %v2289_v19 = vpop.eup %2288 }
 0x441   : > { %2063 = vmatprep.mubr.msk.f32.mxu1 %vm2640_vm3, %v2639_v13 }
 0x444   : > { %2281 = vset.pattern.permute.xlu0 %v2647_v10 }
 0x464   : > { %931 = vadd.xlane.f32.xlu1 %v930_v18 }
 0x475   : > { %1130 = vperm.xlu1 %2278, %v2289_v19  }
 0x479   : > { %2280 = vset.pattern.permute.xlu1 %v2647_v10 }
 0x49f   : > { %v1114_v20 = vpop.permute.xlu0 %1113 }
 0x4a0   : > { %v1116_v21 = vsub.f32 %v3070_v39, %v1114_v20  ;;  %v913_v39 = vld [vmem:[#allocation6] sm:$0xff] }
 0x4a1   : > { %v929_v40 = vmul.f32 %v3089_v0, %v913_v39 }
 0x4a2   : > { %v1117_v22 = vmul.f32 1.442695, %v1116_v21 }
 0x4a4   : > { %2290 = vpow2.f32 %v1117_v22  ;;  %v941_v44 = vpop.permute.xlu0 %940 }
 0x4a9   : > { %v1313_v23 = vpop.permute.xlu1 %1312 }
 0x4aa   : > { %v1315_v24 = vsub.f32 %v3074_v42, %v1313_v23 }
 0x4ac   : > { %v1316_v25 = vmul.f32 1.442695, %v1315_v24 }
 0x4ad   : > { %v1136_v26 = vpop.permute.xlu1 %1135 }
 0x4ae   : > { %2292 = vpow2.f32 %v1316_v25  ;;  %2062 = vmatpush3.msra.mxu1 %v1136_v26 }
 0x4af   : > { %2071 = vmatprep.subr.mxu1 %v2639_v13 }
 0x4b1   : > { %v2291_v27 = vpop.eup %2290 }
 0x4b2   : > { %2064 = vmatmul.mubr.msk.f32.vlgmr.msra.gmra.mxu1 %vm835_vm5, %v2291_v27  ;;  %v1120_v28 = vsel %vm835_vm5, %v2291_v27, 0.0 }
 0x4b3   : > { %v1512_v29 = vpop.permute.xlu1 %1511  ;;  %1121 = vadd.xlane.f32.xlu0 %v1120_v28  ;;  %2073 = vmatprep.mubr.msk.f32.mxu1 %vm2640_vm3, %v2639_v13 }
 0x4b4   : > { %v1514_v30 = vsub.f32 %v3078_v45, %v1512_v29  ;;  %v943_v45 = vmul.f32 %v941_v44, %v937_v43 }
 0x4b6   : > { %v1515_v31 = vmul.f32 1.442695, %v1514_v30 }
 0x4b7   : > { %v1335_v32 = vpop.permute.xlu1 %1334 }
 0x4b8   : > { %2294 = vpow2.f32 %v1515_v31  ;;  %2072 = vmatpush3.msra.mxu1 %v1335_v32 }
 0x4b9   : > { %2081 = vmatprep.subr.mxu1 %v2639_v13  ;;  %2296 = vpow2.f32 %v1507_v35 }
 0x4bb   : > { %v2293_v33 = vpop.eup %2292  ;;  %v1534_v34 = vpop.permute.xlu1 %1533 }
 0x4bc   : > { %2074 = vmatmul.mubr.msk.f32.vlgmr.msra.gmra.mxu1 %vm835_vm5, %v2293_v33  ;;  %v1319_v36 = vsel %vm835_vm5, %v2293_v33, 0.0 }
 0x4bd   : > { %2082 = vmatpush3.msra.mxu1 %v1534_v34  ;;  %1320 = vadd.xlane.f32.xlu1 %v1319_v36 }
 0x4be   : > { %2083 = vmatprep.mubr.msk.f32.mxu1 %vm2640_vm3, %v2639_v13  ;;  %v1330_v13 = vpop.permute.xlu0 %1329 }
 0x4c5   : > { %v2295_v37 = vpop.eup %2294 }
 0x4c6   : > { %2084 = vmatmul.mubr.msk.f32.vlgmr.msra.gmra.mxu1 %vm835_vm5, %v2295_v37  ;;  %v2297_v38 = vpop.eup %2296  ;;  %v1518_v0 = vsel %vm835_vm5, %v2295_v37, 0.0 }
 0x4ce   : > { %1528 = vperm.xlu1 %2280, %v2297_v38  }
 0x4ed   : > { %v932_v41 = vpop.xlane.xlu1 %931 }
 0x4ee   : > { %v933_v42 = vadd.f32 %v932_v41, %v929_v40 }
 0x4f0   : > { %935 = vst.msk [vmem:[#allocation6] sm:$0xff] %vm934_vm6, %v933_v42 }
 0x4f1   : > { %v1131_v53 = vpop.permute.xlu1 %1130 }
 0x4f7   : > { %v1103_v49 = vld [vmem:[#allocation6] sm:$0xff] }
 0x4f8   : > { %v1119_v50 = vmul.f32 %v2289_v19, %v1103_v49 }
 0x4ff   : > { %v1013_v46 = vpop.f32.mrf.mxu1 }
 0x500   : > { %v1017_v47 = vadd.f32 %v1013_v46, %v943_v45 }
 0x501   : > { %v2055_v48 = vpop.f32.mrf.mxu1 }
 0x502   : > { %1018 = vst.msk [vmem:[#allocation7] sm:$0xff] %vm835_vm5, %v1017_v47 }
 0x509   : > { %v1127_v1 = vld [vmem:[#allocation7] sm:$0xff] }
 0x50a   : > { %v1133_v2 = vmul.f32 %v1131_v53, %v1127_v1 }
 0x53c   : > { %v1122_v51 = vpop.xlane.xlu0 %1121 }
 0x53d   : > { %v1123_v52 = vadd.f32 %v1122_v51, %v1119_v50 }
 0x53f   : > { %1125 = vst.msk [vmem:[#allocation6] sm:$0xff] %vm1124_vm7, %v1123_v52 }
 0x546   : > { %v1302_v54 = vld [vmem:[#allocation6] sm:$0xff]  ;;  %v1321_v56 = vpop.xlane.xlu1 %1320 }
 0x547   : > { %v1318_v55 = vmul.f32 %v3096_v16, %v1302_v54 }
 0x549   : > { %v1322_v57 = vadd.f32 %v1321_v56, %v1318_v55 }
 0x54a   : > { %v1529_v9 = vpop.permute.xlu1 %1528 }
 0x54b   : > { %1324 = vst.msk [vmem:[#allocation6] sm:$0xff] %vm1323_vm8, %v1322_v57 }
 0x552   : > { %v1501_v15 = vld [vmem:[#allocation6] sm:$0xff] }
 0x553   : > { %v1517_v16 = vmul.f32 %v2297_v38, %v1501_v15 }
 0x572   : > { %v1207_v58 = vpop.f32.mrf.mxu1 }
 0x573   : > { %1212 = vrot.lane.b32.xlu0 %v1207_v58, %s2648_s22 }
 0x574   : > { %v2065_v59 = vpop.f32.mrf.mxu1 }
 0x57c   : > { %v1406_v60 = vpop.f32.mrf.mxu1 }
 0x57d   : > { %1411 = vrot.lane.b32.xlu0 %v1406_v60, %s2649_s10 }
 0x57e   : > { %v2075_v61 = vpop.f32.mrf.mxu1 }
 0x586   : > { %v1605_v62 = vpop.f32.mrf.mxu1 }
 0x587   : > { %1610 = vrot.lane.b32.xlu1 %v1605_v62, %s2650_s29 }
 0x588   : > { %v2085_v63 = vpop.f32.mrf.mxu1 }
 0x59c   : > { %1519 = vadd.xlane.f32.xlu0 %v1518_v0 }
 0x5e5   : > { %v1213_v3 = vpop.permute.xlu0 %1212 }
 0x5e6   : > { %v1215_v4 = vadd.f32 %v1213_v3, %v1133_v2 }
 0x5e8   : > { %1217 = vst.msk [vmem:[#allocation7] sm:$0xff] %vm1216_vm10, %v1215_v4 }
 0x5ef   : > { %v1326_v5 = vld [vmem:[#allocation7] sm:$0xff]  ;;  %v1412_v7 = vpop.permute.xlu0 %1411 }
 0x5f0   : > { %v1332_v6 = vmul.f32 %v1330_v13, %v1326_v5 }
 0x5f2   : > { %v1414_v8 = vadd.f32 %v1412_v7, %v1332_v6 }
 0x5f4   : > { %1416 = vst.msk [vmem:[#allocation7] sm:$0xff] %vm1415_vm11, %v1414_v8 }
 0x5f9   : > { %v1611_v12 = vpop.permute.xlu1 %1610 }
 0x5fb   : > { %v1525_v10 = vld [vmem:[#allocation7] sm:$0xff] }
 0x5fc   : > { %v1531_v11 = vmul.f32 %v1529_v9, %v1525_v10 }
 0x5fe   : > { %v1613_v14 = vadd.f32 %v1611_v12, %v1531_v11 }
 0x600   : > { %1615 = vst.msk [vmem:[#allocation7] sm:$0xff] %vm1614_vm12, %v1613_v14 }
 0x624   : > { %1619 = sbr.rel (%p1970_p7) target bundleno = 1964 (0x7ac), region = 100 }
 0x625   : > { %v1520_v17 = vpop.xlane.xlu0 %1519 }
 0x626   : > { %v1521_v18 = vadd.f32 %v1520_v17, %v1517_v16 }
 0x628   : > { %1523 = vst.msk [vmem:[#allocation6] sm:$0xff] %vm1522_vm9, %v1521_v18 }
 0x629   : > { %v2651_v20 = vmov 0   ;;  %v2652_v21 = vmov 2   ;;  %v2653_v26 = vmov 1   ;;  %v2654_v27 = vmov 3   ;;  %v1658_v29 = vld [vmem:[#allocation19 + $0x18] sm:$0xff]  ;;  %v1657_v30 = vld [vmem:[#allocation19 + $0x10] sm:$0xff] }
 0x62a   : > { %2298 = vset.pattern.permute.xlu0 %v2651_v20  ;;  %2300 = vset.pattern.permute.xlu1 %v2652_v21  ;;  %v2655_v28 = vmov 0.0   ;;  %vm2656_vm13 = vmmov 0   ;;  %v1656_v31 = vld [vmem:[#allocation19 + $0x8] sm:$0xff]  ;;  %v1655_v32 = vld [vmem:[#allocation19] sm:$0xff] }
 0x62b   : > { %2086 = vmatprep.subr.mxu0 %v2655_v28  ;;  %2094 = vmatprep.mubr.msk.f32.mxu0 %vm2656_vm13, %v2655_v28  ;;  %v1625_v33 = vld [vmem:[#allocation7] sm:$0xff]  ;;  %v1971_v46 = vld [vmem:[%s3281_s13] ss:$0 sm:$0xff] }
 0x62c   : > { %2087 = vmatpush3.msra.mxu0 %v1658_v29 }
 0x62d   : > { %2088 = vmatprep.subr.mxu0 %v2655_v28 }
 0x62e   : > { %2089 = vmatpush3.msra.mxu0 %v1657_v30 }
 0x62f   : > { %v1620_v19 = vld [vmem:[#allocation6] sm:$0xff]  ;;  %2090 = vmatprep.subr.mxu0 %v2655_v28 }
 0x630   : > { %2303 = vrcp.f32 %v1620_v19  ;;  %2091 = vmatpush3.msra.mxu0 %v1656_v31 }
 0x631   : > { %2092 = vmatprep.subr.mxu0 %v2655_v28 }
 0x632   : > { %2093 = vmatpush3.msra.mxu0 %v1655_v32 }
 0x63d   : > { %v2304_v22 = vpop.eup %2303 }
 0x63e   : > { %v1622_v23 = vmul.f32 %v2304_v22, %v1620_v19 }
 0x640   : > { %v1623_v24 = vsub.f32 2.0, %v1622_v23 }
 0x642   : > { %v1624_v25 = vmul.f32 %v2304_v22, %v1623_v24 }
 0x644   : > { %1628 = vperm.xlu0 %2298, %v1624_v25   ;;  %1642 = vperm.xlu1 %2300, %v1624_v25  }
 0x648   : > { %2299 = vset.pattern.permute.xlu0 %v2653_v26  ;;  %2301 = vset.pattern.permute.xlu1 %v2654_v27 }
 0x649   : > { %1635 = vperm.xlu0 %2299, %v1624_v25   ;;  %1649 = vperm.xlu1 %2301, %v1624_v25  }
 0x64d   : > { %2302 = vset.pattern.permute.xlu0 %v2654_v27 }
 0x6bf   : > { %v1629_v34 = vpop.permute.xlu0 %1628  ;;  %v1643_v39 = vpop.permute.xlu1 %1642 }
 0x6c0   : > { %v1631_v35 = vmul.f32 %v1629_v34, %v1625_v33 }
 0x6c2   : > { %1632 = vst.msk [vmem:[#allocation7] sm:$0xff] %vm835_vm5, %v1631_v35 }
 0x6c4   : > { %v1636_v36 = vpop.permute.xlu0 %1635  ;;  %v1650_v42 = vpop.permute.xlu1 %1649 }
 0x6c9   : > { %v1633_v37 = vld [vmem:[#allocation7] sm:$0xff] }
 0x6ca   : > { %v1638_v38 = vmul.f32 %v1636_v36, %v1633_v37 }
 0x6cc   : > { %1639 = vst.msk [vmem:[#allocation7] sm:$0xff] %vm1216_vm10, %v1638_v38 }
 0x6d3   : > { %v1640_v40 = vld [vmem:[#allocation7] sm:$0xff] }
 0x6d4   : > { %v1645_v41 = vmul.f32 %v1643_v39, %v1640_v40 }
 0x6d6   : > { %1646 = vst.msk [vmem:[#allocation7] sm:$0xff] %vm1415_vm11, %v1645_v41 }
 0x6dd   : > { %v1647_v43 = vld [vmem:[#allocation7] sm:$0xff] }
 0x6de   : > { %v1652_v44 = vmul.f32 %v1650_v42, %v1647_v43 }
 0x6e0   : > { %1653 = vst.msk [vmem:[#allocation7] sm:$0xff] %vm1614_vm12, %v1652_v44 }
 0x6e7   : > { %v1654_v45 = vld [vmem:[#allocation7] sm:$0xff] }
 0x6e8   : > { %2095 = vmatmul.mubr.msk.f32.vlgmr.msra.gmra.mxu0 %vm672_vm4, %v1654_v45 }
 0x7a8   : > { %v1735_v47 = vpop.f32.mrf.mxu0 }
 0x7a9   : > { %v1736_v48 = vadd.f32 %v1971_v46, %v1735_v47 }
 0x7aa   : > { %v2096_v13 = vpop.f32.mrf.mxu0 }
 0x7ab   : > { %1739 = vst.msk [vmem:[%s3008_s16] sm:$0xff] %vm672_vm4, %v1736_v48 }
 0x7ac PF: > { %s3282_s15 = sld [smem:[#allocation29_spill]]  ;;  %s1755_s3 = sshll.u32 %s3008_s16, 4  ;;  %s1756_s3 = int_to_ptr.vmem [resolvable:$true] %s1755_s3 }
 0x7ad   : > { %s3283_s18 = sld [smem:[#allocation46_spill]]  ;;  %s1741_s9 = scalar_lea.sflag [#allocation10], %s2980_s5 }
 0x7ae   : > { %s2493_s25 = scalar_lea.vmem %s1756_s3, 128  ;;  %p3285_p6 = scmp.ne.s32.totalorder %s3264_s4, 0 }
 0x7af   : > { %p2494_p1 = scmp.ne.s32.totalorder %s1756_s3, %s2493_s25  ;;  %s2657_s26 = smov [#allocation20]  }
 0x7b0   : > { %s2497_s14 = sshll.u32 %s2657_s26, 4  ;;  %s2498_s14 = int_to_ptr.vmem [resolvable:$false] %s2497_s14 }
 0x7b1   : > { %p2495_p4 = pnand %p2494_p1, %p3285_p6  ;;  %s2499_s30 = scalar_lea.vmem %s2498_s14, 256 }
 0x7b2   : > { %s1974_s24 = sshll.u32 %s3282_s15, 7  ;;  %p2500_p11 = scmp.lt.s32.totalorder %s1756_s3, %s2498_s14 }
 0x7b3   : > { %s3284_s8 = smov %s3283_s18  ;;  %s1753_s6 = scalar_lea.hbm %s3283_s18, %s1974_s24 }
 0x7b4   : > { %p2496_p9 = pneg %p2495_p4  ;;  %p2501_p0 = scmp.lt.s32.totalorder %s2499_s30, %s2493_s25 }
 0x7b6   : > { %p2502_p8 = por %p2501_p0, %p2500_p11 }
 0x7b8   : > { %p2503_p13 = pnand %p2502_p8, %p2496_p9 }
 0x7ba   : > { %2506 = shalt.err (!%p2503_p13)
}
 0x7bb   : > { %s2507_s1 = scalar_lea.hbm %s1753_s6, 128  ;;  %s2511_s22 = scalar_lea.hbm %s3284_s8, 256 }
 0x7bc   : > { %p2508_p3 = scmp.ne.s32.totalorder %s1753_s6, %s2507_s1  ;;  %p2512_p2 = scmp.lt.s32.totalorder %s1753_s6, %s3284_s8 }
 0x7bd   : > { %p2513_p12 = scmp.lt.s32.totalorder %s2511_s22, %s2507_s1 }
 0x7be   : > { %p2509_p10 = pnand %p2508_p3, %p3285_p6 }
 0x7bf   : > { %p2514_p7 = por %p2513_p12, %p2512_p2 }
 0x7c0   : > { %p2510_p5 = pneg %p2509_p10 }
 0x7c2   : > { %p2515_p1 = pnand %p2514_p7, %p2510_p5 }
 0x7c4   : > { %2518 = shalt.err (!%p2515_p1)
}
 0x7c5   : > { %2119 = dma.vmem_to_hbm [thread:$0]  (%p3285_p6), %s1756_s3, 128, %s1753_s6, %s1741_s9  }
 0x7c6 PF: > { %p2157_p4 = scmp.ge.s32.totalorder %s2625_s27, 2  ;;  %s1767_s11 = sand.u32 1, %s2597_s20  }
 0x7c7   : > { %p3286_p9 = scmp.ne.s32.totalorder %s3265_s23, 0  ;;  %s1768_s7 = scalar_lea.sflag [#allocation10], %s1767_s11 }
 0x7c9   : > { %p2145_p11 = pnand %p2157_p4, %p3286_p9 }
 0x7cb   : > { %p2146_p0 = pneg %p2145_p11 }
 0x7cd   : > { %2580 = dma.done.wait (%p2146_p0), %s1768_s7, 128  }
 0x7ce   : > { %2582 = vsyncadd (%p2146_p0), %s1768_s7, 4294967168  ;;  %s32_s27 = sadd.s32 1, %s2625_s27   ;;  %s3287_s17 = sld [smem:[#allocation26_spill]] }
 0x7cf   : > { %p29_p8 = scmp.ge.s32.totalorder %s32_s27, 6   ;;  %s3288_s12 = sld [smem:[#allocation35_spill]] }
 0x7d0   : > { %s3289_s4 = sld [smem:[#allocation27_spill]]  ;;  %s3295_s18 = smov %s2593_s19 }
 0x7d1   : > { %s3290_s22 = sld [smem:[#allocation36_spill]]  ;;  %s3297_s20 = smov %s2601_s21 }
 0x7d2   : > { %s3291_s23 = sld [smem:[#allocation30_spill]]  ;;  %31 = sbr.rel (!%p29_p8) target bundleno = 24 (0x18), region = 157 }
 0x7d3   : > { %s3292_s24 = sld [smem:[#allocation31_spill]] }
 0x7d4   : > { %s3293_s25 = sld [smem:[#allocation32_spill]] }
 0x7d5   : > { %s3294_s26 = sld [smem:[#allocation33_spill]]  ;;  %s3296_s19 = smov %s3288_s12 }
 0x7d6   : > { %s3298_s21 = smov %s3289_s4 }
 0x7d7   :  { %1773 = vsyncpa [#allocation9], 1 }
 0x7d8   :  { %1775 = vsyncpa [#allocation9 + $0x1], 1 }
 0x7d9   :  { %1776 = vsyncpa [#allocation12], 1 }
 0x7da   :  { %1778 = vsyncpa [#allocation12 + $0x1], 1 }
 0x7db   :  { %1779 = vsyncpa [#allocation15], 1 }
 0x7dc   :  { %1780 = vsyncpa [#allocation18], 1 }
 0x7dd   :  { %1781 = vsyncpa [#allocation10], 1 }
 0x7de   :  { %1783 = vsyncpa [#allocation10 + $0x1], 1 }

</bundles_post_ra>
